<compile_context>
chip_gen: v7x
topology: tpu7x:2x2x1
jax: 0.10.0
libtpu: 0.0.40
codegen_flags: <defaults>
</compile_context>

<pallas_src>
import functools
import itertools
import math

import jax
import jax.numpy as jnp
from jax.experimental import pallas as pl
from jax.experimental.pallas import tpu as pltpu

LN_EPS = 1e-5  # torch.nn.LayerNorm default


# --------------------------------- kernel ---------------------------------- #
def _merge_ln_reduce_kernel(x_ref, w_ref, b_ref, o_ref, *, single_dot):
    """Fused 2x2x2 patch merge + LayerNorm(8C) + Linear(8C -> c_out) for one tile.

    x_ref : (tn, 2, th, 2, W2, 2C) consolidated block; dim 1 is the D-corner i,
            dim 3 the H-corner j, and the trailing 2C holds the two W-corners
            back to back, so chunk p = 2*i + j covers channels [p*2C, (p+1)*2C)
            of the virtual torch.cat(..., -1) ordering.
    w_ref : (8C, c_out) if single_dot else (4, 2C, c_out); LayerNorm gamma is
            already folded in (gamma[:, None] * W).
    b_ref : (1, c_out) f32, precomputed beta @ W.
    o_ref : (1, th*W2, c_out) or (tn*th*W2, c_out) flat merged-row slab.
    """
    tn, _, th, _, w2, c2 = x_ref.shape
    c8 = 4 * c2
    m = tn * th * w2
    c_out = b_ref.shape[-1]

    # Four (D,H)-corner chunks, loaded once (f32 for the LN statistics).
    parts = [x_ref[:, i, :, j, :, :].astype(jnp.float32)
             for i in range(2) for j in range(2)]          # 4 x (tn, th, w2, 2C)

    # LayerNorm stats over the virtual 8C concat, accumulated chunk-wise; only
    # `parts` stays live ((x - mean) is recomputed later), ~half the previous
    # f32 working set.
    mean = (parts[0] + parts[1] + parts[2] + parts[3]).sum(axis=-1, keepdims=True)
    mean = mean * (1.0 / c8)
    var = None
    for p in parts:
        d = p - mean
        s = jnp.sum(d * d, axis=-1, keepdims=True)
        var = s if var is None else var + s
    inv = jax.lax.rsqrt(var * (1.0 / c8) + LN_EPS)

    w_dtype = w_ref.dtype
    prec = jax.lax.Precision.HIGHEST if w_dtype == jnp.float32 else None
    if single_dot:
        # 2C % 128 == 0: lane-concat of the chunks is free and one K=8C matmul
        # amortises the MXU pipeline fill that 4 chunk matmuls would pay.
        y = jnp.concatenate([((p - mean) * inv).astype(w_dtype) for p in parts],
                            axis=-1)                        # (tn, th, w2, 8C)
        acc = jnp.dot(y.reshape(m, c8), w_ref[...],
                      preferred_element_type=jnp.float32, precision=prec)
    else:
        # Split-K over the 4 chunks: y @ W == sum_p y[:, p*2C:(p+1)*2C] @ W_p.
        acc = jnp.zeros((m, c_out), jnp.float32)
        for idx in range(4):
            y = ((parts[idx] - mean) * inv).astype(w_dtype).reshape(m, c2)
            acc = acc + jnp.dot(y, w_ref[idx],
                                preferred_element_type=jnp.float32, precision=prec)

    acc = acc + b_ref[...]                                  # folded beta @ W
    o_ref[...] = acc.reshape(o_ref.shape).astype(o_ref.dtype)


# ------------------------------ tiling helpers ------------------------------ #
def _vmem_limit_bytes():
    """Generation-aware scoped-VMEM budget (v5e/v6e: 128 MiB, v7x: 64 MiB physical)."""
    cap = 64 * 1024 * 1024
    try:
        info = pltpu.get_tpu_info()
        cap = int(getattr(info, "vmem_capacity_bytes", cap) or cap)
    except Exception:
        pass
    return max(24 * 1024 * 1024, min(cap * 3 // 4, cap - 20 * 1024 * 1024))


def _pick_tiles(nb, h2, w2, c2, c_out, in_it, w_it, out_it, vmem_limit,
                max_positions_per_step):
    """Pick (tn, th): H2 rows per step, and -- when a whole n=(batch,D2) slice
    fits -- how many consecutive n indices to fuse per step."""
    c8 = 4 * c2
    resident = 2 * c8 * c_out * w_it + 2 * c_out * 4
    # Per merged position: double-buffered input block + f32 chunks / matmul lhs /
    # relayout slack + f32 accumulator + double-buffered output block.
    per_pos = c8 * (2 * in_it + 3 * 4 + w_it) + c_out * (4 + 3 * out_it)
    budget = max(per_pos * w2, int(vmem_limit * 0.6) - resident)
    max_pos = max(w2, budget // per_pos)
    if max_positions_per_step is not None:
        max_pos = min(max_pos, max(w2, int(max_positions_per_step)))

    th = max(1, min(h2, max_pos // w2))
    tn = 1
    if th >= h2:
        th = h2
        tn = max(1, min(nb, max_pos // (h2 * w2)))
        tn = min(tn, max(1, pl.cdiv(nb, 8)))    # keep >=8 steps for pipelining / megacore
        if tn < nb:                             # (8,128) rule on the flat output block
            g = 8 // math.gcd(h2 * w2, 8)
            tn = min(nb, max(g, (tn // g) * g))
    else:
        g = 8 // math.gcd(w2, 8)                # keep th*W2 a multiple of 8
        th = min(h2, max(g, (th // g) * g))
        if th >= h2:
            th, tn = h2, 1
    return tn, th


# ------------------------------- module glue -------------------------------- #
def patch_merging_v2(x, gamma, beta, w_t, *, max_positions_per_step=None,
                     vmem_limit_bytes=None):
    """Forward pass of PatchMergingV2 (spatial_dims=3).

    x:     (B, D, H, W, C) channels-last
    gamma, beta: (8C,) LayerNorm affine
    w_t:   (8C, 2C) nn.Linear weight transposed (in x out), bias-free
    returns (B, ceil(D/2), ceil(H/2), ceil(W/2), 2C)
    """
    b, d, h, w, c = x.shape
    c2, c8 = 2 * c, 8 * c
    assert gamma.shape[-1] == c8 and w_t.shape[0] == c8, (gamma.shape, w_t.shape)
    c_out = w_t.shape[1]

    # F.pad(x, (0,0, 0,w%2, 0,h%2, 0,d%2)): zero-pad W, H, D at the end.
    if (d % 2) or (h % 2) or (w % 2):
        x = jnp.pad(x, ((0, 0), (0, d % 2), (0, h % 2), (0, w % 2), (0, 0)))
    d2, h2, w2 = (d + d % 2) // 2, (h + h % 2) // 2, (w + w % 2) // 2
    nb = b * d2

    # Fold the LayerNorm affine into the reduction weight:
    #   ((x-mu)*inv*gamma + beta) @ W == ((x-mu)*inv) @ (gamma[:,None]*W) + beta @ W
    w_f32 = w_t.astype(jnp.float32)
    w_eff = (gamma.astype(jnp.float32)[:, None] * w_f32).astype(w_t.dtype)
    bias = beta.astype(jnp.float32)[None, :] @ w_f32          # (1, c_out), f32

    # Free (contiguous) reshape: (B, 2*D2, 2*H2, 2*W2, C) -> (B*D2, 2, H2, 2, W2, 2C).
    x_r = x.reshape(nb, 2, h2, 2, w2, c2)

    if vmem_limit_bytes is None:
        vmem_limit_bytes = _vmem_limit_bytes()
    tn, th = _pick_tiles(nb, h2, w2, c2, c_out, x.dtype.itemsize,
                         w_eff.dtype.itemsize, x.dtype.itemsize,
                         vmem_limit_bytes, max_positions_per_step)

    grid = (pl.cdiv(nb, tn), pl.cdiv(h2, th))

    x_spec = pl.BlockSpec((tn, 2, th, 2, w2, c2),
                          lambda nbi, hbi: (nbi, 0, hbi, 0, 0, 0))

    single_dot = (c2 % 128 == 0)
    if single_dot:
        w_arg = w_eff                                          # (8C, c_out)
        w_spec = pl.BlockSpec((c8, c_out), lambda nbi, hbi: (0, 0))
    else:
        w_arg = w_eff.reshape(4, c2, c_out)                    # chunked along K
        w_spec = pl.BlockSpec((4, c2, c_out), lambda nbi, hbi: (0, 0, 0))
    b_spec = pl.BlockSpec((1, c_out), lambda nbi, hbi: (0, 0))

    # Output as flat merged-row views: the store is the matmul's natural (rows, c_out)
    # layout (no reshape/relayout before the store) and each block is one contiguous
    # HBM run.  For c_out >= 128 (the lane-aligned stages) the store is already dense.
    # TODO(synk): for c_out < 128 the store is a masked vst / strided DMA; a lane-dense
    # (th, W2*c_out) slab would need an in-kernel sublane->lane relayout.
    if tn > 1:
        out_struct = jax.ShapeDtypeStruct((nb * h2 * w2, c_out), x.dtype)
        o_spec = pl.BlockSpec((tn * h2 * w2, c_out), lambda nbi, hbi: (nbi, 0))
    else:
        out_struct = jax.ShapeDtypeStruct((nb, h2 * w2, c_out), x.dtype)
        o_spec = pl.BlockSpec((1, th * w2, c_out), lambda nbi, hbi: (nbi, hbi, 0))

    out = pl.pallas_call(
        functools.partial(_merge_ln_reduce_kernel, single_dot=single_dot),
        out_shape=out_struct,
        grid=grid,
        in_specs=[x_spec, w_spec, b_spec],
        out_specs=o_spec,
        compiler_params=pltpu.CompilerParams(
            dimension_semantics=("parallel", "parallel"),
            vmem_limit_bytes=int(vmem_limit_bytes),
        ),
    )(x_r, w_arg, bias)

    return out.reshape(b, d2, h2, w2, c_out)


# --------------------------- pure-JAX reference ---------------------------- #
def _reference(x, gamma, beta, w_t):
    b, d, h, w, c = x.shape
    if (d % 2) or (h % 2) or (w % 2):
        x = jnp.pad(x, ((0, 0), (0, d % 2), (0, h % 2), (0, w % 2), (0, 0)))
    parts = [x[:, i::2, j::2, k::2, :]
             for i, j, k in itertools.product(range(2), range(2), range(2))]
    m = jnp.concatenate(parts, axis=-1).astype(jnp.float32)
    mean = jnp.mean(m, axis=-1, keepdims=True)
    var = jnp.mean((m - mean) ** 2, axis=-1, keepdims=True)
    y = (m - mean) / jnp.sqrt(var + LN_EPS) * gamma.astype(jnp.float32) \
        + beta.astype(jnp.float32)
    return jnp.dot(y, w_t.astype(jnp.float32), precision=jax.lax.Precision.HIGHEST)


# ----------------------------------- test ----------------------------------- #
def _run_case(key, b, d, h, w, c, max_positions_per_step=None):
    k_x, k_g, k_b, k_w = jax.random.split(key, 4)
    x = jax.random.normal(k_x, (b, d, h, w, c), dtype=jnp.float32)
    gamma = 1.0 + 0.1 * jax.random.normal(k_g, (8 * c,), dtype=jnp.float32)
    beta = 0.1 * jax.random.normal(k_b, (8 * c,), dtype=jnp.float32)
    w_lin = 0.02 * jax.random.normal(k_w, (2 * c, 8 * c), dtype=jnp.float32)  # (out, in)
    w_t = jnp.asarray(w_lin.T)                                                # (8C, 2C)

    fwd = jax.jit(functools.partial(patch_merging_v2,
                                    max_positions_per_step=max_positions_per_step))
    out = jax.block_until_ready(fwd(x, gamma, beta, w_t))

    ref = _reference(x, gamma, beta, w_t)
    d2, h2, w2 = (d + d % 2) // 2, (h + h % 2) // 2, (w + w % 2) // 2
    assert out.shape == (b, d2, h2, w2, 2 * c), out.shape
    err = float(jnp.max(jnp.abs(out - ref)))
    assert jnp.allclose(out, ref, atol=1.5e-3, rtol=1.5e-3), err
    return err


if __name__ == "__main__":
    keys = jax.random.split(jax.random.PRNGKey(0), 4)
    # 1) baseline (matches the original test): even dims, chunked split-K path (2C = 32).
    _run_case(keys[0], 2, 8, 16, 16, 16)
    # 2) force row tiling over H2 (partial-H blocks) with a small per-step budget.
    _run_case(keys[1], 1, 4, 32, 16, 16, max_positions_per_step=16)
    # 3) odd D / H exercise the zero-padding path.
    _run_case(keys[2], 2, 5, 7, 16, 8)
    # 4) 2C = 128: lane-aligned single K=8C matmul path.
    _run_case(keys[3], 1, 4, 8, 16, 64)
    print("KERNEL_OK")
</pallas_src>

<mosaic_0001>
module attributes {stable_mosaic.version = 11 : i64} {
  func.func @_merge_ln_reduce_kernel(%arg0: i32, %arg1: i32, %arg2: memref<1x2x8x2x8x32xf32, #tpu.memory_space<vmem>>, %arg3: memref<4x32x32xf32, #tpu.memory_space<vmem>>, %arg4: memref<1x32xf32, #tpu.memory_space<vmem>>, %arg5: memref<1x64x32xf32, #tpu.memory_space<vmem>>) attributes {dimension_semantics = [#tpu.dimension_semantics<parallel>, #tpu.dimension_semantics<parallel>], iteration_bounds = array<i64: 8, 1>, scalar_prefetch = 0 : i64, scratch_operands = 0 : i64, tpu.core_type = #tpu.core_type<tc>, window_params = [{transform_indices = @transform_0, window_bounds = array<i64: 1, 2, 8, 2, 8, 32>}, {pipeline_mode = #tpu.pipeline_mode<synchronous>, transform_indices = @transform_1, window_bounds = array<i64: 4, 32, 32>}, {pipeline_mode = #tpu.pipeline_mode<synchronous>, transform_indices = @transform_2, window_bounds = array<i64: 1, 32>}, {transform_indices = @transform_3, window_bounds = array<i64: 1, 64, 32>}]} {
    %c0 = arith.constant 0 : index
    %c0_0 = arith.constant 0 : index
    %c0_1 = arith.constant 0 : index
    %c0_2 = arith.constant 0 : index
    %c0_3 = arith.constant 0 : index
    %c0_4 = arith.constant 0 : index
    %0 = vector.load %arg2[%c0, %c0_0, %c0_1, %c0_2, %c0_3, %c0_4] : memref<1x2x8x2x8x32xf32, #tpu.memory_space<vmem>>, vector<1x1x8x1x8x32xf32>
    %1 = vector.shape_cast %0 : vector<1x1x8x1x8x32xf32> to vector<1x8x8x32xf32>
    %c0_5 = arith.constant 0 : index
    %c0_6 = arith.constant 0 : index
    %c0_7 = arith.constant 0 : index
    %c1 = arith.constant 1 : index
    %c0_8 = arith.constant 0 : index
    %c0_9 = arith.constant 0 : index
    %2 = vector.load %arg2[%c0_5, %c0_6, %c0_7, %c1, %c0_8, %c0_9] : memref<1x2x8x2x8x32xf32, #tpu.memory_space<vmem>>, vector<1x1x8x1x8x32xf32>
    %3 = vector.shape_cast %2 : vector<1x1x8x1x8x32xf32> to vector<1x8x8x32xf32>
    %c0_10 = arith.constant 0 : index
    %c1_11 = arith.constant 1 : index
    %c0_12 = arith.constant 0 : index
    %c0_13 = arith.constant 0 : index
    %c0_14 = arith.constant 0 : index
    %c0_15 = arith.constant 0 : index
    %4 = vector.load %arg2[%c0_10, %c1_11, %c0_12, %c0_13, %c0_14, %c0_15] : memref<1x2x8x2x8x32xf32, #tpu.memory_space<vmem>>, vector<1x1x8x1x8x32xf32>
    %5 = vector.shape_cast %4 : vector<1x1x8x1x8x32xf32> to vector<1x8x8x32xf32>
    %c0_16 = arith.constant 0 : index
    %c1_17 = arith.constant 1 : index
    %c0_18 = arith.constant 0 : index
    %c1_19 = arith.constant 1 : index
    %c0_20 = arith.constant 0 : index
    %c0_21 = arith.constant 0 : index
    %6 = vector.load %arg2[%c0_16, %c1_17, %c0_18, %c1_19, %c0_20, %c0_21] : memref<1x2x8x2x8x32xf32, #tpu.memory_space<vmem>>, vector<1x1x8x1x8x32xf32>
    %7 = vector.shape_cast %6 : vector<1x1x8x1x8x32xf32> to vector<1x8x8x32xf32>
    %8 = arith.addf %1, %3 : vector<1x8x8x32xf32>
    %9 = arith.addf %8, %5 : vector<1x8x8x32xf32>
    %10 = arith.addf %9, %7 : vector<1x8x8x32xf32>
    %cst = arith.constant dense<0.000000e+00> : vector<1x8x8xf32>
    %11 = vector.multi_reduction <add>, %10, %cst [3] : vector<1x8x8x32xf32> to vector<1x8x8xf32>
    %12 = vector.shape_cast %11 : vector<1x8x8xf32> to vector<1x8x8x1xf32>
    %cst_22 = arith.constant 7.812500e-03 : f32
    %13 = vector.broadcast %cst_22 : f32 to vector<1x8x8x1xf32>
    %14 = arith.mulf %12, %13 : vector<1x8x8x1xf32>
    %15 = vector.broadcast %14 : vector<1x8x8x1xf32> to vector<1x8x8x32xf32>
    %16 = arith.subf %1, %15 : vector<1x8x8x32xf32>
    %17 = arith.mulf %16, %16 : vector<1x8x8x32xf32>
    %cst_23 = arith.constant dense<0.000000e+00> : vector<1x8x8xf32>
    %18 = vector.multi_reduction <add>, %17, %cst_23 [3] : vector<1x8x8x32xf32> to vector<1x8x8xf32>
    %19 = vector.shape_cast %18 : vector<1x8x8xf32> to vector<1x8x8x1xf32>
    %20 = vector.broadcast %14 : vector<1x8x8x1xf32> to vector<1x8x8x32xf32>
    %21 = arith.subf %3, %20 : vector<1x8x8x32xf32>
    %22 = arith.mulf %21, %21 : vector<1x8x8x32xf32>
    %cst_24 = arith.constant dense<0.000000e+00> : vector<1x8x8xf32>
    %23 = vector.multi_reduction <add>, %22, %cst_24 [3] : vector<1x8x8x32xf32> to vector<1x8x8xf32>
    %24 = vector.shape_cast %23 : vector<1x8x8xf32> to vector<1x8x8x1xf32>
    %25 = arith.addf %19, %24 : vector<1x8x8x1xf32>
    %26 = vector.broadcast %14 : vector<1x8x8x1xf32> to vector<1x8x8x32xf32>
    %27 = arith.subf %5, %26 : vector<1x8x8x32xf32>
    %28 = arith.mulf %27, %27 : vector<1x8x8x32xf32>
    %cst_25 = arith.constant dense<0.000000e+00> : vector<1x8x8xf32>
    %29 = vector.multi_reduction <add>, %28, %cst_25 [3] : vector<1x8x8x32xf32> to vector<1x8x8xf32>
    %30 = vector.shape_cast %29 : vector<1x8x8xf32> to vector<1x8x8x1xf32>
    %31 = arith.addf %25, %30 : vector<1x8x8x1xf32>
    %32 = vector.broadcast %14 : vector<1x8x8x1xf32> to vector<1x8x8x32xf32>
    %33 = arith.subf %7, %32 : vector<1x8x8x32xf32>
    %34 = arith.mulf %33, %33 : vector<1x8x8x32xf32>
    %cst_26 = arith.constant dense<0.000000e+00> : vector<1x8x8xf32>
    %35 = vector.multi_reduction <add>, %34, %cst_26 [3] : vector<1x8x8x32xf32> to vector<1x8x8xf32>
    %36 = vector.shape_cast %35 : vector<1x8x8xf32> to vector<1x8x8x1xf32>
    %37 = arith.addf %31, %36 : vector<1x8x8x1xf32>
    %cst_27 = arith.constant 7.812500e-03 : f32
    %38 = vector.broadcast %cst_27 : f32 to vector<1x8x8x1xf32>
    %39 = arith.mulf %37, %38 : vector<1x8x8x1xf32>
    %cst_28 = arith.constant 9.99999974E-6 : f32
    %40 = vector.broadcast %cst_28 : f32 to vector<1x8x8x1xf32>
    %41 = arith.addf %39, %40 : vector<1x8x8x1xf32>
    %42 = math.rsqrt %41 : vector<1x8x8x1xf32>
    %cst_29 = arith.constant 0.000000e+00 : f32
    %43 = vector.broadcast %cst_29 : f32 to vector<64x32xf32>
    %44 = vector.broadcast %14 : vector<1x8x8x1xf32> to vector<1x8x8x32xf32>
    %45 = arith.subf %1, %44 : vector<1x8x8x32xf32>
    %46 = vector.broadcast %42 : vector<1x8x8x1xf32> to vector<1x8x8x32xf32>
    %47 = arith.mulf %45, %46 : vector<1x8x8x32xf32>
    %48 = vector.shape_cast %47 : vector<1x8x8x32xf32> to vector<64x32xf32>
    %c0_30 = arith.constant 0 : index
    %c0_31 = arith.constant 0 : index
    %c0_32 = arith.constant 0 : index
    %49 = vector.load %arg3[%c0_30, %c0_31, %c0_32] : memref<4x32x32xf32, #tpu.memory_space<vmem>>, vector<1x32x32xf32>
    %50 = vector.shape_cast %49 : vector<1x32x32xf32> to vector<32x32xf32>
    %cst_33 = arith.constant dense<0.000000e+00> : vector<64x32xf32>
    %51 = tpu.matmul %48, %50, %cst_33 {dimension_numbers = #tpu.dot_dimension_numbers<[1], [0], [0], [1], [0, 0, 1, 1], [], []>, precision = #tpu.contract_precision<fp32>} : vector<64x32xf32>, vector<32x32xf32>, vector<64x32xf32> -> vector<64x32xf32>
    %52 = arith.addf %43, %51 : vector<64x32xf32>
    %53 = vector.broadcast %14 : vector<1x8x8x1xf32> to vector<1x8x8x32xf32>
    %54 = arith.subf %3, %53 : vector<1x8x8x32xf32>
    %55 = vector.broadcast %42 : vector<1x8x8x1xf32> to vector<1x8x8x32xf32>
    %56 = arith.mulf %54, %55 : vector<1x8x8x32xf32>
    %57 = vector.shape_cast %56 : vector<1x8x8x32xf32> to vector<64x32xf32>
    %c1_34 = arith.constant 1 : index
    %c0_35 = arith.constant 0 : index
    %c0_36 = arith.constant 0 : index
    %58 = vector.load %arg3[%c1_34, %c0_35, %c0_36] : memref<4x32x32xf32, #tpu.memory_space<vmem>>, vector<1x32x32xf32>
    %59 = vector.shape_cast %58 : vector<1x32x32xf32> to vector<32x32xf32>
    %cst_37 = arith.constant dense<0.000000e+00> : vector<64x32xf32>
    %60 = tpu.matmul %57, %59, %cst_37 {dimension_numbers = #tpu.dot_dimension_numbers<[1], [0], [0], [1], [0, 0, 1, 1], [], []>, precision = #tpu.contract_precision<fp32>} : vector<64x32xf32>, vector<32x32xf32>, vector<64x32xf32> -> vector<64x32xf32>
    %61 = arith.addf %52, %60 : vector<64x32xf32>
    %62 = vector.broadcast %14 : vector<1x8x8x1xf32> to vector<1x8x8x32xf32>
    %63 = arith.subf %5, %62 : vector<1x8x8x32xf32>
    %64 = vector.broadcast %42 : vector<1x8x8x1xf32> to vector<1x8x8x32xf32>
    %65 = arith.mulf %63, %64 : vector<1x8x8x32xf32>
    %66 = vector.shape_cast %65 : vector<1x8x8x32xf32> to vector<64x32xf32>
    %c2 = arith.constant 2 : index
    %c0_38 = arith.constant 0 : index
    %c0_39 = arith.constant 0 : index
    %67 = vector.load %arg3[%c2, %c0_38, %c0_39] : memref<4x32x32xf32, #tpu.memory_space<vmem>>, vector<1x32x32xf32>
    %68 = vector.shape_cast %67 : vector<1x32x32xf32> to vector<32x32xf32>
    %cst_40 = arith.constant dense<0.000000e+00> : vector<64x32xf32>
    %69 = tpu.matmul %66, %68, %cst_40 {dimension_numbers = #tpu.dot_dimension_numbers<[1], [0], [0], [1], [0, 0, 1, 1], [], []>, precision = #tpu.contract_precision<fp32>} : vector<64x32xf32>, vector<32x32xf32>, vector<64x32xf32> -> vector<64x32xf32>
    %70 = arith.addf %61, %69 : vector<64x32xf32>
    %71 = vector.broadcast %14 : vector<1x8x8x1xf32> to vector<1x8x8x32xf32>
    %72 = arith.subf %7, %71 : vector<1x8x8x32xf32>
    %73 = vector.broadcast %42 : vector<1x8x8x1xf32> to vector<1x8x8x32xf32>
    %74 = arith.mulf %72, %73 : vector<1x8x8x32xf32>
    %75 = vector.shape_cast %74 : vector<1x8x8x32xf32> to vector<64x32xf32>
    %c3 = arith.constant 3 : index
    %c0_41 = arith.constant 0 : index
    %c0_42 = arith.constant 0 : index
    %76 = vector.load %arg3[%c3, %c0_41, %c0_42] : memref<4x32x32xf32, #tpu.memory_space<vmem>>, vector<1x32x32xf32>
    %77 = vector.shape_cast %76 : vector<1x32x32xf32> to vector<32x32xf32>
    %cst_43 = arith.constant dense<0.000000e+00> : vector<64x32xf32>
    %78 = tpu.matmul %75, %77, %cst_43 {dimension_numbers = #tpu.dot_dimension_numbers<[1], [0], [0], [1], [0, 0, 1, 1], [], []>, precision = #tpu.contract_precision<fp32>} : vector<64x32xf32>, vector<32x32xf32>, vector<64x32xf32> -> vector<64x32xf32>
    %79 = arith.addf %70, %78 : vector<64x32xf32>
    %c0_44 = arith.constant 0 : index
    %c0_45 = arith.constant 0 : index
    %80 = vector.load %arg4[%c0_44, %c0_45] : memref<1x32xf32, #tpu.memory_space<vmem>>, vector<1x32xf32>
    %81 = vector.broadcast %80 : vector<1x32xf32> to vector<64x32xf32>
    %82 = arith.addf %79, %81 : vector<64x32xf32>
    %83 = vector.shape_cast %82 : vector<64x32xf32> to vector<1x64x32xf32>
    %c0_46 = arith.constant 0 : index
    %c0_47 = arith.constant 0 : index
    %c0_48 = arith.constant 0 : index
    %84 = vector.load %arg5[%c0_46, %c0_47, %c0_48] : memref<1x64x32xf32, #tpu.memory_space<vmem>>, vector<1x64x32xf32>
    tpu.vector_store %arg5[%c0_46, %c0_47, %c0_48], %83 {strides = array<i32>} : memref<1x64x32xf32, #tpu.memory_space<vmem>>, vector<1x64x32xf32>,
    return
  }
  func.func @transform_0(%arg0: i32, %arg1: i32) -> (i32, i32, i32, i32, i32, i32) {
    %c0_i32 = arith.constant 0 : i32
    %c0_i32_0 = arith.constant 0 : i32
    %c0_i32_1 = arith.constant 0 : i32
    %c0_i32_2 = arith.constant 0 : i32
    %c0_i32_3 = arith.constant 0 : i32
    return %arg0, %c0_i32, %arg1, %c0_i32_0, %c0_i32_1, %c0_i32_2 : i32, i32, i32, i32, i32, i32
  }
  func.func @transform_1(%arg0: i32, %arg1: i32) -> (i32, i32, i32) {
    %c0_i32 = arith.constant 0 : i32
    %c0_i32_0 = arith.constant 0 : i32
    %c0_i32_1 = arith.constant 0 : i32
    %c0_i32_2 = arith.constant 0 : i32
    return %c0_i32, %c0_i32_0, %c0_i32_1 : i32, i32, i32
  }
  func.func @transform_2(%arg0: i32, %arg1: i32) -> (i32, i32) {
    %c0_i32 = arith.constant 0 : i32
    %c0_i32_0 = arith.constant 0 : i32
    %c0_i32_1 = arith.constant 0 : i32
    return %c0_i32, %c0_i32_0 : i32, i32
  }
  func.func @transform_3(%arg0: i32, %arg1: i32) -> (i32, i32, i32) {
    %c0_i32 = arith.constant 0 : i32
    %c0_i32_0 = arith.constant 0 : i32
    return %arg0, %arg1, %c0_i32 : i32, i32, i32
  }
}

</mosaic_0001>

<bundles_post_ra>
// kernel: patch_merging_v2.1
= control target key start
LH: loop header
LB: loop body
LE: loop exit
PB: predicated region body
PF: predicated region fallthrough
CT: control target
= control target key end

     0   :  { %8 = vsyncpa [#allocation3], 0  ;;  %s6628_s0 = inlined_call_operand.vmem [shape: f32[8,2,8,2,8,32], index: 0, kind: input, shape index: {}]   ;;  %s6629_s1 = inlined_call_operand.vmem [shape: f32[4,32,32], index: 1, kind: input, shape index: {}]   ;;  %s6630_s2 = inlined_call_operand.vmem [shape: f32[1,32], index: 2, kind: input, shape index: {}]   ;;  %s6631_s3 = inlined_call_operand.hbm [shape: f32[8,64,32], index: 3, kind: output, shape index: {}]  }
   0x1   :  { %10 = vsyncpa [#allocation3 + $0x1], 0  ;;  %s5303_s12 = smov 0   ;;  %s5305_s13 = smov 0  }
   0x2   :  { %s5307_s14 = smov 0   ;;  %s5309_s15 = smov 0  }
   0x3   :  { %s5311_s16 = smov 0   ;;  %s5313_s17 = smov 0  }
   0x4 LB: > { %s3931_s18 = sadd.s32 4294967295, %s5278_s17   ;;  %s3932_s19 = sadd.s32 4294967294, %s5278_s17   ;;  %s5278_s17 = sphi %s5313_s17, %s16_s17   ;;  %s5274_s16 = sphi %s5311_s16, %s6767_s16   ;;  %s5270_s15 = sphi %s5309_s15, %s6766_s15   ;;  %s5266_s14 = sphi %s5307_s14, %s6765_s14   ;;  %s5262_s13 = sphi %s5305_s13, %s6764_s13   ;;  %s5258_s12 = sphi %s5303_s12, %s6763_s12  }
   0x5   : > { %s28_s20 = sadd.s32 1, %s5274_s16  ;;  %s107_s21 = sadd.s32 1, %s5266_s14 }
   0x6   : > { %p30_p0 = scmp.ge.s32.totalorder %s28_s20, 8  ;;  %p117_p1 = scmp.ne.s32.totalorder %s5266_s14, %s5262_s13 }
   0x7   : > { %p118_p2 = scmp.eq.s32.totalorder %s3931_s18, 7  ;;  %p123_p3 = scmp.ne.s32.totalorder %s5262_s13, %s5258_s12 }
   0x8   : > { %s6769_s20 = smov (%p30_p0, %s28_s20), 0  ;;  %p124_p5 = scmp.eq.s32.totalorder %s3932_s19, 7 }
   0x9   : > { %p5343_p4 = por %p118_p2, %p117_p1  ;;  %s102_s23 = ssub.s32 %s5274_s16, %s6769_s20 }
   0xa   : > { %p3935_p6 = scmp.ge.s32.totalorder %s5278_s17, 1  ;;  %p105_p7 = scmp.eq.s32.totalorder %s102_s23, 0 }
   0xb   : > { %p5350_p8 = por %p124_p5, %p123_p3  ;;  %p162_p9 = scmp.lt.s32.totalorder %s5278_s17, 9 }
   0xc   : > { %s5356_s25 = scalar_select %p105_p7, %s5266_s14, %s107_s21  }
   0xd   : > { %p163_p10 = pnand %p3935_p6, %p162_p9 }
   0xf   : > { %166 = sbr.rel (%p163_p10) target bundleno = 828 (0x33c), region = 32 }
  0x16   : > { %p192_p11 = scmp.lt.s32.totalorder %s5270_s15, 7  ;;  %vm262_vm0 = vcmask 261120   ;;  %s188_s29 = sand.u32 1, %s5262_s13  }
  0x17   : > { %s3982_s7 = sshll.u32 %s5270_s15, 10  ;;  %s5280_s19 = smov [#allocation2]  }
  0x18   : > { %s193_s26 = scalar_select %p192_p11, %s5270_s15, 7 }
  0x19   : > { %s6572_s11 = scalar_lea.hbm %s6631_s3, %s3982_s7  ;;  %s6582_s15 = scalar_lea.sflag [#allocation3], %s188_s29 }
  0x1a   : > { %s3981_s27 = sshll.u32 %s193_s26, 8  ;;  %s5204_s21 = sshll.u32 %s5280_s19, 4  ;;  %s5205_s21 = int_to_ptr.vmem [resolvable:$false] %s5204_s21 }
  0x1b   : > { %s5363_s30 = scalar_lea.vmem %s6628_s0, %s3981_s27  ;;  %s5206_s23 = scalar_lea.vmem %s5205_s21, 2048 }
  0x1c   : > { %v5366_v0 = vld [vmem:[%s5363_s30] sm:$0xff]  ;;  %v5369_v1 = vld [vmem:[%s5363_s30 + $0x8] sm:$0xff]  ;;  %v5377_v4 = vld [vmem:[%s5363_s30 + $0x10] sm:$0xff] }
  0x1d   : > { %v5372_v2 = vld [vmem:[%s5363_s30 + $0x80] sm:$0xff]  ;;  %v238_v3 = vadd.f32 %v5369_v1, %v5366_v0  ;;  %v5380_v5 = vld [vmem:[%s5363_s30 + $0x18] sm:$0xff]  ;;  %v5383_v6 = vld [vmem:[%s5363_s30 + $0x88] sm:$0xff] }
  0x1e   : > { %v5386_v7 = vld [vmem:[%s5363_s30 + $0x90] sm:$0xff]  ;;  %v239_v8 = vadd.f32 %v5380_v5, %v5377_v4  ;;  %v5391_v9 = vld [vmem:[%s5363_s30 + $0x20] sm:$0xff]  ;;  %v5395_v11 = vld [vmem:[%s5363_s30 + $0x98] sm:$0xff] }
  0x1f   : > { %v246_v10 = vadd.f32 %v5372_v2, %v238_v3  ;;  %v5398_v12 = vld [vmem:[%s5363_s30 + $0x28] sm:$0xff]  ;;  %v5401_v13 = vld [vmem:[%s5363_s30 + $0xa0] sm:$0xff]  ;;  %v5407_v16 = vld [vmem:[%s5363_s30 + $0x30] sm:$0xff] }
  0x20   : > { %v247_v14 = vadd.f32 %v5386_v7, %v239_v8  ;;  %v240_v15 = vadd.f32 %v5398_v12, %v5391_v9  ;;  %v5410_v17 = vld [vmem:[%s5363_s30 + $0x38] sm:$0xff]  ;;  %v5413_v18 = vld [vmem:[%s5363_s30 + $0xb0] sm:$0xff]  ;;  %v5417_v20 = vld [vmem:[%s5363_s30 + $0xa8] sm:$0xff] }
  0x21   : > { %v254_v19 = vadd.f32 %v5383_v6, %v246_v10  ;;  %v241_v21 = vadd.f32 %v5410_v17, %v5407_v16  ;;  %v5422_v22 = vld [vmem:[%s5363_s30 + $0x40] sm:$0xff]  ;;  %v5425_v23 = vld [vmem:[%s5363_s30 + $0x48] sm:$0xff]  ;;  %v5430_v26 = vld [vmem:[%s5363_s30 + $0xb8] sm:$0xff] }
  0x22   : > { %v255_v24 = vadd.f32 %v5395_v11, %v247_v14  ;;  %v248_v25 = vadd.f32 %v5401_v13, %v240_v15  ;;  %v5433_v27 = vld [vmem:[%s5363_s30 + $0xc0] sm:$0xff]  ;;  %v242_v28 = vadd.f32 %v5425_v23, %v5422_v22  ;;  %v5438_v29 = vld [vmem:[%s5363_s30 + $0x50] sm:$0xff]  ;;  %v5443_v32 = vld [vmem:[%s5363_s30 + $0xc8] sm:$0xff] }
  0x23   : > { %v263_v30 = vsel %vm262_vm0, %v254_v19, 0.0  ;;  %v249_v31 = vadd.f32 %v5413_v18, %v241_v21  ;;  %v5446_v33 = vld [vmem:[%s5363_s30 + $0x58] sm:$0xff]  ;;  %v5449_v34 = vld [vmem:[%s5363_s30 + $0xd0] sm:$0xff]  ;;  %v5456_v38 = vld [vmem:[%s5363_s30 + $0x60] sm:$0xff] }
  0x24   : > { %264 = vadd.xlane.f32.xlu0 %v263_v30  ;;  %v256_v35 = vadd.f32 %v5417_v20, %v248_v25  ;;  %v250_v36 = vadd.f32 %v5433_v27, %v242_v28  ;;  %v243_v37 = vadd.f32 %v5446_v33, %v5438_v29  ;;  %v5459_v39 = vld [vmem:[%s5363_s30 + $0x68] sm:$0xff]  ;;  %v5462_v40 = vld [vmem:[%s5363_s30 + $0xe0] sm:$0xff]  ;;  %v266_v41 = vsel %vm262_vm0, %v255_v24, 0.0  ;;  %v5467_v43 = vld [vmem:[%s5363_s30 + $0xd8] sm:$0xff] }
  0x25   : > { %v257_v42 = vadd.f32 %v5430_v26, %v249_v31  ;;  %v244_v44 = vadd.f32 %v5459_v39, %v5456_v38  ;;  %v5472_v45 = vld [vmem:[%s5363_s30 + $0x70] sm:$0xff]  ;;  %v5475_v46 = vld [vmem:[%s5363_s30 + $0x78] sm:$0xff]  ;;  %v5481_v50 = vld [vmem:[%s5363_s30 + $0xe8] sm:$0xff] }
  0x26   : > { %v269_v47 = vsel %vm262_vm0, %v256_v35, 0.0  ;;  %v258_v48 = vadd.f32 %v5443_v32, %v250_v36  ;;  %v251_v49 = vadd.f32 %v5449_v34, %v243_v37  ;;  %v5484_v51 = vld [vmem:[%s5363_s30 + $0xf0] sm:$0xff]  ;;  %v245_v52 = vadd.f32 %v5475_v46, %v5472_v45  ;;  %v5495_v59 = vld [vmem:[%s5363_s30 + $0xf8] sm:$0xff]  ;;  %s3936_s30 = sshll.u32 %s188_s29, 6 }
  0x27   : > { %270 = vadd.xlane.f32.xlu1 %v269_v47  ;;  %v252_v53 = vadd.f32 %v5462_v40, %v244_v44  ;;  %v272_v54 = vsel %vm262_vm0, %v257_v42, 0.0  ;;  %s6553_s6 = scalar_lea.vmem [#allocation2], %s3936_s30 }
  0x28   : > { %267 = vadd.xlane.f32.xlu0 %v266_v41  ;;  %v259_v55 = vadd.f32 %v5467_v43, %v251_v49  ;;  %v253_v56 = vadd.f32 %v5484_v51, %v245_v52  ;;  %v275_v57 = vsel %vm262_vm0, %v258_v48, 0.0  ;;  %s3849_s8 = sshll.u32 %s6553_s6, 4  ;;  %s6574_s8 = int_to_ptr.vmem [resolvable:$true] %s3849_s8 }
  0x29   : > { %v260_v58 = vadd.f32 %v5481_v50, %v252_v53  ;;  %s5200_s18 = scalar_lea.vmem %s6574_s8, 1024  ;;  %p5207_p1 = scmp.lt.s32.totalorder %s6574_s8, %s5205_s21 }
  0x2a   : > { %v278_v60 = vsel %vm262_vm0, %v259_v55, 0.0  ;;  %v261_v61 = vadd.f32 %v5495_v59, %v253_v56  ;;  %p5201_p12 = scmp.ne.s32.totalorder %s6574_s8, %s5200_s18  ;;  %p5208_p2 = scmp.lt.s32.totalorder %s5206_s23, %s5200_s18 }
  0x2b   : > { %273 = vadd.xlane.f32.xlu1 %v272_v54  ;;  %v281_v62 = vsel %vm262_vm0, %v260_v58, 0.0 }
  0x2c   : > { %276 = vadd.xlane.f32.xlu0 %v275_v57  ;;  %v284_v63 = vsel %vm262_vm0, %v261_v61, 0.0  ;;  %p5202_p13 = pnand %p5201_p12, %p5343_p4  ;;  %p5209_p3 = por %p5208_p2, %p5207_p1 }
  0x2e   : > { %p5203_p0 = pneg %p5202_p13 }
  0x2f   : > { %279 = vadd.xlane.f32.xlu1 %v278_v60 }
  0x30   : > { %282 = vadd.xlane.f32.xlu0 %v281_v62  ;;  %p5210_p5 = pnand %p5209_p3, %p5203_p0 }
  0x33   : > { %285 = vadd.xlane.f32.xlu1 %v284_v63 }
  0xb1   : > { %v265_v3 = vpop.xlane.xlu0 %264 }
  0xb2   : > { %v287_v8 = vmul.f32 0.0078125, %v265_v3 }
  0xb4   : > { %v5502_v10 = vsub.f32 %v5369_v1, %v287_v8  ;;  %v5505_v14 = vsub.f32 %v5366_v0, %v287_v8  ;;  %v271_v15 = vpop.xlane.xlu1 %270  ;;  %v5514_v30 = vsub.f32 %v5372_v2, %v287_v8  ;;  %v5555_v54 = vsub.f32 %v5383_v6, %v287_v8 }
  0xb5   : > { %v268_v19 = vpop.xlane.xlu0 %267  ;;  %v5507_v21 = vmul.f32 0.0078125, %v271_v15 }
  0xb6   : > { %v288_v24 = vmul.f32 0.0078125, %v268_v19  ;;  %v343_v25 = vmul.f32 %v5502_v10, %v5502_v10  ;;  %v303_v28 = vmul.f32 %v5505_v14, %v5505_v14 }
  0xb7   : > { %v5529_v2 = vsub.f32 %v5398_v12, %v5507_v21  ;;  %v391_v12 = vmul.f32 %v5514_v30, %v5514_v30  ;;  %v5572_v3 = vsub.f32 %v5401_v13, %v5507_v21 }
  0xb8   : > { %v351_v1 = vsel %vm262_vm0, %v343_v25, 0.0  ;;  %v311_v31 = vsel %vm262_vm0, %v303_v28, 0.0  ;;  %v5519_v0 = vsub.f32 %v5380_v5, %v288_v24  ;;  %v5522_v35 = vsub.f32 %v5377_v4, %v288_v24  ;;  %v274_v36 = vpop.xlane.xlu1 %273 }
  0xb9   : > { %352 = vadd.xlane.f32.xlu1 %v351_v1  ;;  %312 = vadd.xlane.f32.xlu0 %v311_v31  ;;  %v5525_v37 = vsub.f32 %v5386_v7, %v288_v24  ;;  %v290_v42 = vmul.f32 0.0078125, %v274_v36  ;;  %v5537_v4 = vsub.f32 %v5391_v9, %v5507_v21  ;;  %v345_v48 = vmul.f32 %v5529_v2, %v5529_v2  ;;  %v277_v58 = vpop.xlane.xlu0 %276 }
  0xba   : > { %v344_v41 = vmul.f32 %v5519_v0, %v5519_v0  ;;  %v304_v5 = vmul.f32 %v5522_v35, %v5522_v35  ;;  %v399_v53 = vsel %vm262_vm0, %v391_v12, 0.0  ;;  %v5564_v60 = vsub.f32 %v5395_v11, %v288_v24 }
  0xbb   : > { %6685 = vst [vmem:[#allocation5_spill] sm:$0xff] %v5537_v4  ;;  %v392_v47 = vmul.f32 %v5525_v37, %v5525_v37  ;;  %v305_v49 = vmul.f32 %v5537_v4, %v5537_v4  ;;  %v5550_v9 = vsub.f32 %v5407_v16, %v290_v42  ;;  %v357_v55 = vsel %vm262_vm0, %v345_v48, 0.0 }
  0xbc   : > { %v354_v44 = vsel %vm262_vm0, %v344_v41, 0.0  ;;  %v314_v7 = vsel %vm262_vm0, %v304_v5, 0.0  ;;  %v439_v16 = vmul.f32 %v5555_v54, %v5555_v54  ;;  %6687 = vst [vmem:[#allocation7_spill] sm:$0xff] %v5564_v60  ;;  %v5567_v61 = vsub.f32 %v5410_v17, %v290_v42  ;;  %v280_v63 = vpop.xlane.xlu1 %279 }
  0xbd   : > { %355 = vadd.xlane.f32.xlu1 %v354_v44  ;;  %315 = vadd.xlane.f32.xlu0 %v314_v7  ;;  %6686 = vst [vmem:[#allocation6_spill] sm:$0xff] %v5550_v9  ;;  %v402_v52 = vsel %vm262_vm0, %v392_v47, 0.0  ;;  %v317_v56 = vsel %vm262_vm0, %v305_v49, 0.0  ;;  %v306_v57 = vmul.f32 %v5550_v9, %v5550_v9  ;;  %v291_v62 = vmul.f32 0.0078125, %v277_v58  ;;  %v283_v12 = vpop.xlane.xlu0 %282 }
  0xbe   : > { %v447_v8 = vsel %vm262_vm0, %v439_v16, 0.0  ;;  %v440_v15 = vmul.f32 %v5564_v60, %v5564_v60  ;;  %v346_v11 = vmul.f32 %v5567_v61, %v5567_v61  ;;  %v5580_v17 = vsub.f32 %v5413_v18, %v290_v42 }
  0xbf   : > { %v320_v6 = vsel %vm262_vm0, %v306_v57, 0.0  ;;  %v292_v19 = vmul.f32 0.0078125, %v280_v63  ;;  %v5583_v24 = vsub.f32 %v5425_v23, %v291_v62  ;;  %v5586_v13 = vsub.f32 %v5422_v22, %v291_v62 }
  0xc0   : > { %v450_v25 = vsel %vm262_vm0, %v440_v15, 0.0  ;;  %v360_v28 = vsel %vm262_vm0, %v346_v11, 0.0  ;;  %v394_v1 = vmul.f32 %v5580_v17, %v5580_v17  ;;  %v393_v18 = vmul.f32 %v5572_v3, %v5572_v3 }
  0xc1   : > { %403 = vadd.xlane.f32.xlu1 %v402_v52  ;;  %400 = vadd.xlane.f32.xlu0 %v399_v53  ;;  %6688 = vst [vmem:[#allocation8_spill] sm:$0xff] %v5586_v13  ;;  %v347_v31 = vmul.f32 %v5583_v24, %v5583_v24  ;;  %v307_v23 = vmul.f32 %v5586_v13, %v5586_v13  ;;  %v286_v53 = vpop.xlane.xlu1 %285 }
  0xc2   : > { %v5599_v22 = vsub.f32 %v5438_v29, %v292_v19  ;;  %v408_v36 = vsel %vm262_vm0, %v394_v1, 0.0  ;;  %v405_v41 = vsel %vm262_vm0, %v393_v18, 0.0  ;;  %v5605_v5 = vsub.f32 %v5417_v20, %v5507_v21 }
  0xc3   : > { %v363_v44 = vsel %vm262_vm0, %v347_v31, 0.0  ;;  %v323_v7 = vsel %vm262_vm0, %v307_v23, 0.0  ;;  %v5612_v29 = vsub.f32 %v5430_v26, %v290_v42  ;;  %v5617_v49 = vsub.f32 %v5446_v33, %v292_v19 }
  0xc4   : > { %6689 = vst [vmem:[#allocation9_spill] sm:$0xff] %v5599_v22  ;;  %6690 = vst [vmem:[#allocation10_spill] sm:$0xff] %v5605_v5  ;;  %v308_v47 = vmul.f32 %v5599_v22, %v5599_v22  ;;  %v441_v48 = vmul.f32 %v5605_v5, %v5605_v5  ;;  %v293_v21 = vmul.f32 0.0078125, %v283_v12  ;;  %v5626_v42 = vsub.f32 %v5449_v34, %v292_v19 }
  0xc5   : > { %358 = vadd.xlane.f32.xlu1 %v357_v55  ;;  %318 = vadd.xlane.f32.xlu0 %v317_v56  ;;  %6691 = vst [vmem:[#allocation11_spill] sm:$0xff] %v5612_v29  ;;  %v442_v52 = vmul.f32 %v5612_v29, %v5612_v29  ;;  %v348_v26 = vmul.f32 %v5617_v49, %v5617_v49  ;;  %v294_v56 = vmul.f32 0.0078125, %v286_v53 }
  0xc6   : > { %v326_v20 = vsel %vm262_vm0, %v308_v47, 0.0  ;;  %v453_v55 = vsel %vm262_vm0, %v441_v48, 0.0  ;;  %v5629_v33 = vsub.f32 %v5433_v27, %v291_v62  ;;  %v5632_v57 = vsub.f32 %v5459_v39, %v293_v21  ;;  %v3964_v48 = vld [vmem:[%s6629_s1 + $0x28] sm:$0xff] }
  0xc7   : > { %v5635_v58 = vsub.f32 %v5456_v38, %v293_v21  ;;  %v456_v16 = vsel %vm262_vm0, %v442_v52, 0.0  ;;  %v396_v34 = vmul.f32 %v5626_v42, %v5626_v42  ;;  %v5648_v38 = vsub.f32 %v5472_v45, %v294_v56 }
  0xc8   : > { %v395_v27 = vmul.f32 %v5629_v33, %v5629_v33  ;;  %v349_v63 = vmul.f32 %v5632_v57, %v5632_v57  ;;  %v5653_v11 = vsub.f32 %v5443_v32, %v291_v62  ;;  %v5662_v18 = vsub.f32 %v5467_v43, %v292_v19 }
  0xc9   : > { %321 = vadd.xlane.f32.xlu1 %v320_v6  ;;  %448 = vadd.xlane.f32.xlu0 %v447_v8  ;;  %6692 = vst [vmem:[#allocation12_spill] sm:$0xff] %v5635_v58  ;;  %v366_v6 = vsel %vm262_vm0, %v348_v26, 0.0  ;;  %v309_v39 = vmul.f32 %v5635_v58, %v5635_v58  ;;  %6693 = vst [vmem:[#allocation13_spill] sm:$0xff] %v5648_v38  ;;  %v414_v8 = vsel %vm262_vm0, %v396_v34, 0.0  ;;  %v556_v53 = vand.u32 4294901760, %v3964_v48 }
  0xca   : > { %v411_v15 = vsel %vm262_vm0, %v395_v27, 0.0  ;;  %6694 = vst [vmem:[#allocation14_spill] sm:$0xff] %v5653_v11  ;;  %v310_v1 = vmul.f32 %v5648_v38, %v5648_v38  ;;  %v443_v45 = vmul.f32 %v5653_v11, %v5653_v11  ;;  %6695 = vst [vmem:[#allocation15_spill] sm:$0xff] %v5662_v18  ;;  %v5665_v31 = vsub.f32 %v5475_v46, %v294_v56  ;;  %v3965_v27 = vld [vmem:[%s6629_s1 + $0x30] sm:$0xff] }
  0xcb   : > { %v5669_v62 = vsub.f32 %v5484_v51, %v294_v56  ;;  %v5677_v43 = vsub.f32 %v5462_v40, %v293_v21  ;;  %v5682_v19 = vsub.f32 %v5495_v59, %v294_v56  ;;  %v5685_v51 = vsub.f32 %v5481_v50, %v293_v21  ;;  %v3963_v50 = vld [vmem:[%s6629_s1 + $0x20] sm:$0xff] }
  0xcc   : > { %v332_v32 = vsel %vm262_vm0, %v310_v1, 0.0  ;;  %v459_v23 = vsel %vm262_vm0, %v443_v45, 0.0  ;;  %v553_v52 = vand.u32 4294901760, %v3963_v50 }
  0xcd   : > { %451 = vadd.xlane.f32.xlu1 %v450_v25  ;;  %361 = vadd.xlane.f32.xlu0 %v360_v28  ;;  %v369_v25 = vsel %vm262_vm0, %v349_v63, 0.0  ;;  %v329_v28 = vsel %vm262_vm0, %v309_v39, 0.0  ;;  %v398_v46 = vmul.f32 %v5669_v62, %v5669_v62  ;;  %6696 = vst [vmem:[#allocation16_spill] sm:$0xff] %v5682_v19  ;;  %6697 = vst [vmem:[#allocation17_spill] sm:$0xff] %v5685_v51  ;;  %v3966_v63 = vld [vmem:[%s6629_s1 + $0x38] sm:$0xff]  ;;  %v3969_v39 = vld [vmem:[%s6629_s1 + $0x50] sm:$0xff] }
  0xce   : > { %v397_v47 = vmul.f32 %v5677_v43, %v5677_v43  ;;  %v446_v12 = vmul.f32 %v5682_v19, %v5682_v19  ;;  %v445_v59 = vmul.f32 %v5685_v51, %v5685_v51  ;;  %v2192_v1 = vand.u32 4294901760, %v3969_v39 }
  0xcf   : > { %v420_v40 = vsel %vm262_vm0, %v398_v46, 0.0 }
  0xd0   : > { %v417_v21 = vsel %vm262_vm0, %v397_v47, 0.0  ;;  %v2350_v51 = vsub.f32 %v3969_v39, %v2192_v1 }
  0xd1   : > { %409 = vadd.xlane.f32.xlu1 %v408_v36  ;;  %406 = vadd.xlane.f32.xlu0 %v405_v41  ;;  %v444_v36 = vmul.f32 %v5662_v18, %v5662_v18  ;;  %v350_v41 = vmul.f32 %v5665_v31, %v5665_v31 }
  0xd5   : > { %364 = vadd.xlane.f32.xlu1 %v363_v44  ;;  %324 = vadd.xlane.f32.xlu0 %v323_v7  ;;  %v462_v44 = vsel %vm262_vm0, %v444_v36, 0.0  ;;  %v372_v7 = vsel %vm262_vm0, %v350_v41, 0.0  ;;  %v703_v36 = vsub.f32 %v3963_v50, %v553_v52  ;;  %v710_v41 = vsub.f32 %v3964_v48, %v556_v53 }
  0xd7   : > { %v711_v47 = vand.u32 4294901760, %v710_v41 }
  0xd9   : > { %327 = vadd.xlane.f32.xlu1 %v326_v20  ;;  %454 = vadd.xlane.f32.xlu0 %v453_v55  ;;  %v3967_v20 = vld [vmem:[%s6629_s1 + $0x40] sm:$0xff]  ;;  %v3968_v55 = vld [vmem:[%s6629_s1 + $0x48] sm:$0xff] }
  0xda   : > { %v2186_v26 = vand.u32 4294901760, %v3967_v20  ;;  %v2189_v56 = vand.u32 4294901760, %v3968_v55 }
  0xdc   : > { %v5712_v34 = vpack.c.bf16 %v2189_v56, %v2186_v26  ;;  %v2336_v46 = vsub.f32 %v3967_v20, %v2186_v26  ;;  %v2351_v20 = vand.u32 4294901760, %v2350_v51 }
  0xdd   : > { %457 = vadd.xlane.f32.xlu1 %v456_v16  ;;  %367 = vadd.xlane.f32.xlu0 %v366_v6  ;;  %v5709_v16 = vpack.c.bf16 %v556_v53, %v553_v52  ;;  %v468_v6 = vsel %vm262_vm0, %v446_v12, 0.0 }
  0xde   : > { %4848 = vmatprep.subr.bf16.mxu0 %v5712_v34  ;;  %v2352_v29 = vsub.f32 %v2350_v51, %v2351_v20 }
  0xdf   : > { %4752 = vmatprep.subr.bf16.mxu1 %v5709_v16  ;;  %4850 = vmatpush3.bf16.msra.mxu0 %v5712_v34 }
  0xe0   : > { %4754 = vmatpush3.bf16.msra.mxu1 %v5709_v16  ;;  %v2353_v39 = vand.u32 4294901760, %v2352_v29 }
  0xe1   : > { %415 = vadd.xlane.f32.xlu1 %v414_v8  ;;  %412 = vadd.xlane.f32.xlu0 %v411_v15  ;;  %v465_v8 = vsel %vm262_vm0, %v445_v59, 0.0  ;;  %v559_v15 = vand.u32 4294901760, %v3965_v27 }
  0xe3   : > { %v717_v19 = vsub.f32 %v3965_v27, %v559_v15 }
  0xe5   : > { %370 = vadd.xlane.f32.xlu1 %v369_v25  ;;  %330 = vadd.xlane.f32.xlu0 %v329_v28  ;;  %v562_v25 = vand.u32 4294901760, %v3966_v63  ;;  %v3970_v28 = vld [vmem:[%s6629_s1 + $0x58] sm:$0xff]  ;;  %v718_v50 = vand.u32 4294901760, %v717_v19 }
  0xe6   : > { %v2195_v45 = vand.u32 4294901760, %v3970_v28 }
  0xe7   : > { %v724_v38 = vsub.f32 %v3966_v63, %v562_v25  ;;  %v719_v26 = vsub.f32 %v717_v19, %v718_v50 }
  0xe8   : > { %v2357_v58 = vsub.f32 %v3970_v28, %v2195_v45 }
  0xe9   : > { %333 = vadd.xlane.f32.xlu1 %v332_v32  ;;  %460 = vadd.xlane.f32.xlu0 %v459_v23  ;;  %v5730_v32 = vpack.c.bf16 %v562_v25, %v559_v15  ;;  %v5733_v23 = vpack.c.bf16 %v2195_v45, %v2192_v1  ;;  %v725_v48 = vand.u32 4294901760, %v724_v38  ;;  %v720_v27 = vand.u32 4294901760, %v719_v26 }
  0xea   : > { %v2358_v52 = vand.u32 4294901760, %v2357_v58 }
  0xeb   : > { %4756 = vmatprep.subr.bf16.mxu1 %v5730_v32  ;;  %4852 = vmatprep.subr.bf16.mxu0 %v5733_v23 }
  0xec   : > { %4758 = vmatpush3.bf16.msra.mxu1 %v5730_v32  ;;  %4854 = vmatpush3.bf16.msra.mxu0 %v5733_v23  ;;  %v2359_v9 = vsub.f32 %v2357_v58, %v2358_v52 }
  0xed   : > { %463 = vadd.xlane.f32.xlu1 %v462_v44  ;;  %373 = vadd.xlane.f32.xlu0 %v372_v7  ;;  %v2343_v44 = vsub.f32 %v3968_v55, %v2189_v56  ;;  %v704_v7 = vand.u32 4294901760, %v703_v36  ;;  %v726_v56 = vsub.f32 %v724_v38, %v725_v48 }
  0xee   : > { %v2360_v15 = vand.u32 4294901760, %v2359_v9 }
  0xef   : > { %v2344_v12 = vand.u32 4294901760, %v2343_v44  ;;  %v705_v59 = vsub.f32 %v703_v36, %v704_v7  ;;  %v727_v63 = vand.u32 4294901760, %v726_v56  ;;  %v5757_v1 = vpack.c.bf16 %v711_v47, %v704_v7 }
  0xf0   : > { %v5747_v28 = vpack.c.bf16 %v2360_v15, %v2353_v39 }
  0xf1   : > { %421 = vadd.xlane.f32.xlu1 %v420_v40  ;;  %418 = vadd.xlane.f32.xlu0 %v417_v21  ;;  %v2337_v40 = vand.u32 4294901760, %v2336_v46  ;;  %v712_v21 = vsub.f32 %v710_v41, %v711_v47  ;;  %v706_v18 = vand.u32 4294901760, %v705_v59  ;;  %v5745_v25 = vpack.c.bf16 %v727_v63, %v720_v27 }
  0xf3   : > { %v713_v22 = vand.u32 4294901760, %v712_v21  ;;  %v5759_v45 = vpack.c.bf16 %v2344_v12, %v2337_v40 }
  0xf5   : > { %469 = vadd.xlane.f32.xlu1 %v468_v6  ;;  %466 = vadd.xlane.f32.xlu0 %v465_v8  ;;  %v2338_v6 = vsub.f32 %v2336_v46, %v2337_v40  ;;  %v2345_v8 = vsub.f32 %v2343_v44, %v2344_v12  ;;  %v5739_v53 = vpack.c.bf16 %v713_v22, %v706_v18 }
  0xf6   : > { %v5749_v22 = vpack.c.bf16 %v710_v41, %v703_v36  ;;  %v5755_v18 = vpack.c.bf16 %v2357_v58, %v2350_v51 }
  0xf7   : > { %v2339_v11 = vand.u32 4294901760, %v2338_v6  ;;  %v2346_v13 = vand.u32 4294901760, %v2345_v8  ;;  %4760 = vmatprep.subr.bf16.mxu1 %v5739_v53  ;;  %v5761_v6 = vpack.c.bf16 %v725_v48, %v718_v50  ;;  %v5763_v8 = vpack.c.bf16 %v2358_v52, %v2351_v20 }
  0xf9   : > { %v5741_v55 = vpack.c.bf16 %v2346_v13, %v2339_v11  ;;  %v5751_v13 = vpack.c.bf16 %v2343_v44, %v2336_v46  ;;  %v5753_v11 = vpack.c.bf16 %v724_v38, %v717_v19 }
  0xfb   : > { %4856 = vmatprep.subr.bf16.mxu0 %v5741_v55 }
 0x146   : > { %v353_v59 = vpop.xlane.xlu1 %352  ;;  %v313_v21 = vpop.xlane.xlu0 %312 }
 0x147   : > { %v375_v38 = vadd.f32 %v353_v59, %v313_v21 }
 0x14a   : > { %v356_v29 = vpop.xlane.xlu1 %355  ;;  %v316_v9 = vpop.xlane.xlu0 %315 }
 0x14b   : > { %v376_v7 = vadd.f32 %v356_v29, %v316_v9 }
 0x14e   : > { %v404_v36 = vpop.xlane.xlu1 %403  ;;  %v401_v41 = vpop.xlane.xlu0 %400 }
 0x14f   : > { %v423_v19 = vadd.f32 %v401_v41, %v375_v38  ;;  %v424_v40 = vadd.f32 %v404_v36, %v376_v7 }
 0x152   : > { %v359_v46 = vpop.xlane.xlu1 %358  ;;  %v319_v44 = vpop.xlane.xlu0 %318 }
 0x153   : > { %v377_v59 = vadd.f32 %v359_v46, %v319_v44 }
 0x156   : > { %v322_v58 = vpop.xlane.xlu1 %321  ;;  %v449_v51 = vpop.xlane.xlu0 %448 }
 0x157   : > { %v471_v47 = vadd.f32 %v449_v51, %v423_v19 }
 0x159   : > { %v479_v12 = vmul.f32 0.0078125, %v471_v47 }
 0x15a   : > { %v452_v26 = vpop.xlane.xlu1 %451  ;;  %v362_v56 = vpop.xlane.xlu0 %361 }
 0x15b   : > { %v487_v27 = vadd.f32 1e-05, %v479_v12  ;;  %v472_v63 = vadd.f32 %v452_v26, %v424_v40  ;;  %v378_v9 = vadd.f32 %v362_v56, %v322_v58 }
 0x15d   : > { %5184 = vrsqrt.f32 %v487_v27  ;;  %v480_v50 = vmul.f32 0.0078125, %v472_v63 }
 0x15e   : > { %v410_v48 = vpop.xlane.xlu1 %409  ;;  %v407_v20 = vpop.xlane.xlu0 %406 }
 0x15f   : > { %v488_v52 = vadd.f32 1e-05, %v480_v50  ;;  %v425_v21 = vadd.f32 %v407_v20, %v377_v59  ;;  %v426_v7 = vadd.f32 %v410_v48, %v378_v9 }
 0x161   : > { %5186 = vrsqrt.f32 %v488_v52 }
 0x162   : > { %v365_v39 = vpop.xlane.xlu1 %364  ;;  %v325_v15 = vpop.xlane.xlu0 %324 }
 0x166   : > { %v328_v41 = vpop.xlane.xlu1 %327  ;;  %v455_v38 = vpop.xlane.xlu0 %454 }
 0x167   : > { %v5765_v29 = vpop.eup %5184  ;;  %v473_v36 = vadd.f32 %v455_v38, %v425_v21 }
 0x168   : > { %v515_v19 = vmul.f32 %v5765_v29, %v5502_v10  ;;  %v2148_v51 = vmul.f32 %v5765_v29, %v5514_v30 }
 0x169   : > { %v481_v47 = vmul.f32 0.0078125, %v473_v36 }
 0x16a   : > { %v458_v40 = vpop.xlane.xlu1 %457  ;;  %v368_v12 = vpop.xlane.xlu0 %367  ;;  %v529_v26 = vsel %vm262_vm0, %v515_v19, 0  ;;  %v2162_v46 = vsel %vm262_vm0, %v2148_v51, 0 }
 0x16b   : > { %v5773_v44 = vpop.eup %5186  ;;  %v489_v27 = vadd.f32 1e-05, %v481_v47  ;;  %v474_v63 = vadd.f32 %v458_v40, %v426_v7  ;;  %v5775_v58 = vand.u32 4294901760, %v529_v26  ;;  %v5777_v56 = vand.u32 4294901760, %v2162_v46 }
 0x16c   : > { %v516_v10 = vmul.f32 %v5773_v44, %v5519_v0  ;;  %v2149_v30 = vmul.f32 %v5773_v44, %v5525_v37 }
 0x16d   : > { %5188 = vrsqrt.f32 %v489_v27  ;;  %v482_v50 = vmul.f32 0.0078125, %v474_v63  ;;  %v5784_v48 = vsub.f32 %v529_v26, %v5775_v58  ;;  %v5787_v59 = vsub.f32 %v2162_v46, %v5777_v56 }
 0x16e   : > { %v416_v20 = vpop.xlane.xlu1 %415  ;;  %v413_v52 = vpop.xlane.xlu0 %412  ;;  %v532_v21 = vsel %vm262_vm0, %v516_v10, 0  ;;  %v2165_v38 = vsel %vm262_vm0, %v2149_v30, 0  ;;  %v379_v27 = vadd.f32 %v365_v39, %v325_v15  ;;  %v380_v15 = vadd.f32 %v368_v12, %v328_v41 }
 0x16f   : > { %v490_v9 = vadd.f32 1e-05, %v482_v50  ;;  %v6642_v0 = vand.u32 4294901760, %v5784_v48  ;;  %v6644_v36 = vand.u32 4294901760, %v5787_v59  ;;  %v5793_v37 = vand.u32 4294901760, %v532_v21 }
 0x170   : > { %v5795_v19 = vand.u32 4294901760, %v2165_v38 }
 0x171   : > { %5190 = vrsqrt.f32 %v490_v9  ;;  %v624_v51 = vsub.f32 %v5784_v48, %v6642_v0  ;;  %v2257_v40 = vsub.f32 %v5787_v59, %v6644_v36  ;;  %v5804_v26 = vsub.f32 %v532_v21, %v5793_v37 }
 0x172   : > { %v371_v7 = vpop.xlane.xlu1 %370  ;;  %v331_v47 = vpop.xlane.xlu0 %330  ;;  %v5807_v46 = vsub.f32 %v2165_v38, %v5795_v19  ;;  %v427_v9 = vadd.f32 %v413_v52, %v379_v27 }
 0x173   : > { %v625_v63 = vand.u32 4294901760, %v624_v51  ;;  %v2258_v10 = vand.u32 4294901760, %v2257_v40  ;;  %v6645_v30 = vand.u32 4294901760, %v5804_v26 }
 0x174   : > { %v6647_v50 = vand.u32 4294901760, %v5807_v46 }
 0x175   : > { %4279 = vmatprep.mubr.f32.mxu1 %v625_v63  ;;  %4519 = vmatprep.mubr.f32.mxu0 %v2258_v10  ;;  %v634_v21 = vsub.f32 %v5804_v26, %v6645_v30  ;;  %v428_v63 = vadd.f32 %v416_v20, %v380_v15  ;;  %v381_v15 = vadd.f32 %v371_v7, %v331_v47 }
 0x176   : > { %v334_v0 = vpop.xlane.xlu1 %333  ;;  %v461_v5 = vpop.xlane.xlu0 %460  ;;  %v2267_v38 = vsub.f32 %v5807_v46, %v6647_v50 }
 0x177   : > { %v5817_v39 = vpop.eup %5188  ;;  %v475_v51 = vadd.f32 %v461_v5, %v427_v9  ;;  %v635_v40 = vand.u32 4294901760, %v634_v21 }
 0x178   : > { %v2268_v36 = vand.u32 4294901760, %v2267_v38  ;;  %v517_v52 = vmul.f32 %v5817_v39, %v5529_v2  ;;  %v2150_v27 = vmul.f32 %v5817_v39, %v5572_v3 }
 0x179   : > { %v483_v10 = vmul.f32 0.0078125, %v475_v51  ;;  %4280 = vmatmul.mubr.f32.vlgmr.msra.gmra.mrb[0].mxu1 %v635_v40 }
 0x17a   : > { %4520 = vmatmul.mubr.f32.vlgmr.msra.gmra.mrb[0].mxu0 %v2268_v36  ;;  %v464_v30 = vpop.xlane.xlu1 %463  ;;  %v374_v4 = vpop.xlane.xlu0 %373  ;;  %v535_v50 = vsel %vm262_vm0, %v517_v52, 0  ;;  %v2168_v60 = vsel %vm262_vm0, %v2150_v27, 0  ;;  %4762 = vmatpush3.bf16.msra.mxu1 %v5739_v53 }
 0x17b   : > { %v5825_v41 = vpop.eup %5190  ;;  %v491_v5 = vadd.f32 1e-05, %v483_v10  ;;  %v476_v12 = vadd.f32 %v464_v30, %v428_v63  ;;  %v5827_v9 = vand.u32 4294901760, %v535_v50  ;;  %4858 = vmatpush3.bf16.msra.mxu0 %v5741_v55  ;;  %v5831_v2 = vand.u32 4294901760, %v2168_v60  ;;  %4764 = vmatprep.subr.bf16.mxu1 %v5745_v25 }
 0x17c   : > { %v518_v3 = vmul.f32 %v5825_v41, %v5567_v61  ;;  %v2151_v20 = vmul.f32 %v5825_v41, %v5580_v17  ;;  %4860 = vmatprep.subr.bf16.mxu0 %v5747_v28  ;;  %v382_v51 = vadd.f32 %v374_v4, %v334_v0 }
 0x17d   : > { %5192 = vrsqrt.f32 %v491_v5  ;;  %v484_v36 = vmul.f32 0.0078125, %v476_v12  ;;  %v5840_v30 = vsub.f32 %v535_v50, %v5827_v9  ;;  %v5843_v55 = vsub.f32 %v2168_v60, %v5831_v2 }
 0x17e   : > { %v422_v53 = vpop.xlane.xlu1 %421  ;;  %v419_v21 = vpop.xlane.xlu0 %418  ;;  %v538_v38 = vsel %vm262_vm0, %v518_v3, 0  ;;  %v2171_v61 = vsel %vm262_vm0, %v2151_v20, 0  ;;  %4766 = vmatpush3.bf16.msra.mxu1 %v5745_v25 }
 0x17f   : > { %v492_v17 = vadd.f32 1e-05, %v484_v36  ;;  %v6656_v40 = vand.u32 4294901760, %v5840_v30  ;;  %4862 = vmatpush3.bf16.msra.mxu0 %v5747_v28  ;;  %v6653_v50 = vand.u32 4294901760, %v5843_v55  ;;  %v5851_v52 = vand.u32 4294901760, %v538_v38  ;;  %4768 = vmatprep.subr.bf16.mxu1 %v5749_v22 }
 0x180   : > { %v5853_v27 = vand.u32 4294901760, %v2171_v61  ;;  %4864 = vmatprep.subr.bf16.mxu0 %v5751_v13  ;;  %v430_v60 = vadd.f32 %v422_v53, %v382_v51  ;;  %v429_v7 = vadd.f32 %v419_v21, %v381_v15 }
 0x181   : > { %5194 = vrsqrt.f32 %v492_v17  ;;  %v644_v4 = vsub.f32 %v5840_v30, %v6656_v40  ;;  %v2277_v28 = vsub.f32 %v5843_v55, %v6653_v50  ;;  %v5864_v47 = vsub.f32 %v538_v38, %v5851_v52 }
 0x182   : > { %v470_v25 = vpop.xlane.xlu1 %469  ;;  %v467_v0 = vpop.xlane.xlu0 %466  ;;  %v5867_v63 = vsub.f32 %v2171_v61, %v5853_v27 }
 0x183   : > { %v478_v10 = vadd.f32 %v470_v25, %v430_v60  ;;  %v477_v5 = vadd.f32 %v467_v0, %v429_v7  ;;  %v645_v12 = vand.u32 4294901760, %v644_v4  ;;  %v2278_v3 = vand.u32 4294901760, %v2277_v28 }
 0x184   : > { %v6652_v20 = vand.u32 4294901760, %v5864_v47  ;;  %v6649_v36 = vand.u32 4294901760, %v5867_v63 }
 0x185   : > { %v486_v53 = vmul.f32 0.0078125, %v478_v10  ;;  %v485_v21 = vmul.f32 0.0078125, %v477_v5  ;;  %4282 = vmatprep.mubr.f32.mxu1 %v645_v12  ;;  %4522 = vmatprep.mubr.f32.mxu0 %v2278_v3 }
 0x186   : > { %v654_v38 = vsub.f32 %v5864_v47, %v6652_v20  ;;  %v2287_v61 = vsub.f32 %v5867_v63, %v6649_v36 }
 0x187   : > { %v5877_v15 = vpop.eup %5192  ;;  %v494_v17 = vadd.f32 1e-05, %v486_v53  ;;  %v493_v51 = vadd.f32 1e-05, %v485_v21 }
 0x188   : > { %v655_v60 = vand.u32 4294901760, %v654_v38  ;;  %v2288_v7 = vand.u32 4294901760, %v2287_v61  ;;  %v519_v4 = vmul.f32 %v5877_v15, %v5583_v24  ;;  %v2152_v25 = vmul.f32 %v5877_v15, %v5629_v33 }
 0x189   : > { %5196 = vrsqrt.f32 %v494_v17 }
 0x18a   : > { %5198 = vrsqrt.f32 %v493_v51  ;;  %4283 = vmatmul.mubr.f32.gmra.mrb[2].mxu1 %v655_v60  ;;  %4523 = vmatmul.mubr.f32.gmra.mrb[2].mxu0 %v2288_v7  ;;  %v541_v0 = vsel %vm262_vm0, %v519_v4, 0  ;;  %v2174_v28 = vsel %vm262_vm0, %v2152_v25, 0 }
 0x18b   : > { %v5885_v10 = vpop.eup %5194  ;;  %v5887_v5 = vand.u32 4294901760, %v541_v0  ;;  %v5889_v12 = vand.u32 4294901760, %v2174_v28 }
 0x18c   : > { %6698 = vst [vmem:[#allocation18_spill] sm:$0xff] %v5885_v10  ;;  %v520_v24 = vmul.f32 %v5885_v10, %v5617_v49  ;;  %v2153_v33 = vmul.f32 %v5885_v10, %v5626_v42 }
 0x18d   : > { %v5896_v3 = vsub.f32 %v541_v0, %v5887_v5  ;;  %v5899_v53 = vsub.f32 %v2174_v28, %v5889_v12 }
 0x18e   : > { %v544_v21 = vsel %vm262_vm0, %v520_v24, 0  ;;  %v2177_v38 = vsel %vm262_vm0, %v2153_v33, 0 }
 0x18f   : > { %v6650_v61 = vand.u32 4294901760, %v5896_v3  ;;  %v6651_v17 = vand.u32 4294901760, %v5899_v53  ;;  %v5905_v51 = vand.u32 4294901760, %v544_v21  ;;  %v5907_v49 = vand.u32 4294901760, %v2177_v38 }
 0x191   : > { %v664_v42 = vsub.f32 %v5896_v3, %v6650_v61  ;;  %v2297_v60 = vsub.f32 %v5899_v53, %v6651_v17  ;;  %v5916_v7 = vsub.f32 %v544_v21, %v5905_v51  ;;  %v5919_v4 = vsub.f32 %v2177_v38, %v5907_v49 }
 0x193   : > { %v5921_v25 = vpop.eup %5196  ;;  %v665_v0 = vand.u32 4294901760, %v664_v42  ;;  %v2298_v28 = vand.u32 4294901760, %v2297_v60  ;;  %v6654_v24 = vand.u32 4294901760, %v5916_v7  ;;  %v6655_v33 = vand.u32 4294901760, %v5919_v4 }
 0x194   : > { %6699 = vst [vmem:[#allocation19_spill] sm:$0xff] %v5921_v25  ;;  %v5925_v36 = vpop.eup %5198  ;;  %v522_v61 = vmul.f32 %v5921_v25, %v5665_v31  ;;  %v2155_v21 = vmul.f32 %v5921_v25, %v5669_v62 }
 0x195   : > { %6700 = vst [vmem:[#allocation20_spill] sm:$0xff] %v5925_v36  ;;  %4285 = vmatprep.mubr.f32.mxu1 %v665_v0  ;;  %4525 = vmatprep.mubr.f32.mxu0 %v2298_v28  ;;  %v674_v38 = vsub.f32 %v5916_v7, %v6654_v24  ;;  %v2307_v42 = vsub.f32 %v5919_v4, %v6655_v33 }
 0x196   : > { %v521_v60 = vmul.f32 %v5925_v36, %v5632_v57  ;;  %v2154_v17 = vmul.f32 %v5925_v36, %v5677_v43  ;;  %v550_v31 = vsel %vm262_vm0, %v522_v61, 0  ;;  %v2183_v62 = vsel %vm262_vm0, %v2155_v21, 0 }
 0x197   : > { %v675_v0 = vand.u32 4294901760, %v674_v38  ;;  %v2308_v28 = vand.u32 4294901760, %v2307_v42  ;;  %v5944_v50 = vand.u32 4294901760, %v550_v31  ;;  %v5949_v40 = vand.u32 4294901760, %v2183_v62 }
 0x198   : > { %v547_v20 = vsel %vm262_vm0, %v521_v60, 0  ;;  %v2180_v33 = vsel %vm262_vm0, %v2154_v17, 0 }
 0x199   : > { %v5946_v24 = vand.u32 4294901760, %v547_v20  ;;  %4286 = vmatmul.mubr.f32.gmra.mrb[4].mxu1 %v675_v0  ;;  %4526 = vmatmul.mubr.f32.gmra.mrb[4].mxu0 %v2308_v28  ;;  %v5951_v57 = vand.u32 4294901760, %v2180_v33  ;;  %v5954_v43 = vsub.f32 %v550_v31, %v5944_v50  ;;  %v5960_v21 = vsub.f32 %v2183_v62, %v5949_v40 }
 0x19b   : > { %v5957_v61 = vsub.f32 %v547_v20, %v5946_v24  ;;  %v5963_v38 = vsub.f32 %v2180_v33, %v5951_v57  ;;  %v693_v17 = vand.u32 4294901760, %v5954_v43  ;;  %v2326_v60 = vand.u32 4294901760, %v5960_v21 }
 0x19d   : > { %v683_v42 = vand.u32 4294901760, %v5957_v61  ;;  %v2316_v0 = vand.u32 4294901760, %v5963_v38  ;;  %v694_v31 = vsub.f32 %v5954_v43, %v693_v17  ;;  %v2327_v33 = vsub.f32 %v5960_v21, %v2326_v60 }
 0x19f   : > { %v684_v20 = vsub.f32 %v5957_v61, %v683_v42  ;;  %v2317_v62 = vsub.f32 %v5963_v38, %v2316_v0  ;;  %v695_v28 = vand.u32 4294901760, %v694_v31  ;;  %v2328_v36 = vand.u32 4294901760, %v2327_v33 }
 0x1a1   : > { %v685_v25 = vand.u32 4294901760, %v684_v20  ;;  %v2318_v10 = vand.u32 4294901760, %v2317_v62 }
 0x1a3   : > { %4288 = vmatprep.mubr.f32.mxu1 %v685_v25  ;;  %4528 = vmatprep.mubr.f32.mxu0 %v2318_v10  ;;  %v6706_v10 = vand.u32 4294901760, %v5843_v55 }
 0x1a4   : > { %4289 = vmatmul.mubr.f32.gmra.mrb[6].mxu1 %v695_v28  ;;  %4529 = vmatmul.mubr.f32.gmra.mrb[6].mxu0 %v2328_v36  ;;  %v6705_v36 = vand.u32 4294901760, %v5840_v30 }
 0x1a5   : > { %4299 = vmatprep.mubr.f32.mxu1 %v5775_v58  ;;  %4539 = vmatprep.mubr.f32.mxu0 %v5777_v56 }
 0x1a8   : > { %4300 = vmatmul.mubr.f32.vlgmr.msra.gmra.mrb[0].mxu1 %v5793_v37  ;;  %4540 = vmatmul.mubr.f32.vlgmr.msra.gmra.mrb[0].mxu0 %v5795_v19 }
 0x1a9   : > { %4770 = vmatpush3.bf16.msra.mxu1 %v5749_v22  ;;  %4866 = vmatpush3.bf16.msra.mxu0 %v5751_v13  ;;  %v6701_v22 = vand.u32 4294901760, %v5784_v48  ;;  %v6702_v13 = vand.u32 4294901760, %v5787_v59 }
 0x1aa   : > { %4302 = vmatprep.mubr.f32.mxu1 %v5827_v9  ;;  %4542 = vmatprep.mubr.f32.mxu0 %v5831_v2 }
 0x1ab   : > { %4772 = vmatprep.subr.bf16.mxu1 %v5753_v11  ;;  %4868 = vmatprep.subr.bf16.mxu0 %v5755_v18 }
 0x1ac   : > { %4303 = vmatmul.mubr.f32.gmra.mrb[2].mxu1 %v5851_v52  ;;  %4543 = vmatmul.mubr.f32.gmra.mrb[2].mxu0 %v5853_v27 }
 0x1ad   : > { %4305 = vmatprep.mubr.f32.mxu1 %v5887_v5  ;;  %4545 = vmatprep.mubr.f32.mxu0 %v5889_v12 }
 0x1ae   : > { %4774 = vmatpush3.bf16.msra.mxu1 %v5753_v11  ;;  %4870 = vmatpush3.bf16.msra.mxu0 %v5755_v18  ;;  %v6703_v11 = vand.u32 4294901760, %v5804_v26  ;;  %v6704_v18 = vand.u32 4294901760, %v5807_v46 }
 0x1af   : > { %4776 = vmatprep.subr.bf16.mxu1 %v5709_v16  ;;  %4872 = vmatprep.subr.bf16.mxu0 %v5712_v34 }
 0x1b0   : > { %4306 = vmatmul.mubr.f32.gmra.mrb[4].mxu1 %v5905_v51  ;;  %4546 = vmatmul.mubr.f32.gmra.mrb[4].mxu0 %v5907_v49 }
 0x1b1   : > { %4308 = vmatprep.mubr.f32.mxu1 %v5946_v24  ;;  %4548 = vmatprep.mubr.f32.mxu0 %v5951_v57 }
 0x1b4   : > { %4309 = vmatmul.mubr.f32.gmra.mrb[6].mxu1 %v5944_v50  ;;  %4549 = vmatmul.mubr.f32.gmra.mrb[6].mxu0 %v5949_v40 }
 0x1b5   : > { %4319 = vmatprep.mubr.f32.mxu1 %v5784_v48  ;;  %4559 = vmatprep.mubr.f32.mxu0 %v5787_v59  ;;  %v6707_v48 = vand.u32 4294901760, %v5864_v47  ;;  %v2979_v59 = vmul.f32 %v5765_v29, %v5555_v54  ;;  %v512_v54 = vld [vmem:[%s6629_s1 + $0x8] sm:$0xff] }
 0x1b8   : > { %4320 = vmatmul.mubr.f32.vlgmr.msra.gmra.mrb[0].mxu1 %v5804_v26  ;;  %4560 = vmatmul.mubr.f32.vlgmr.msra.gmra.mrb[0].mxu0 %v5807_v46  ;;  %v6709_v26 = vand.u32 4294901760, %v5896_v3  ;;  %v6710_v46 = vand.u32 4294901760, %v5899_v53 }
 0x1b9   : > { %4778 = vmatpush3.bf16.msra.mxu1 %v5709_v16  ;;  %4874 = vmatpush3.bf16.msra.mxu0 %v5712_v34 }
 0x1ba   : > { %4322 = vmatprep.mubr.f32.mxu1 %v5840_v30  ;;  %4562 = vmatprep.mubr.f32.mxu0 %v5843_v55  ;;  %v6711_v30 = vand.u32 4294901760, %v5916_v7  ;;  %v2993_v55 = vsel %vm262_vm0, %v2979_v59, 0  ;;  %v3974_v59 = vld [vmem:[%s6629_s1 + $0x78] sm:$0xff] }
 0x1bb   : > { %4780 = vmatprep.subr.bf16.mxu1 %v5730_v32  ;;  %4876 = vmatprep.subr.bf16.mxu0 %v5733_v23  ;;  %v6087_v20 = vand.u32 4294901760, %v2993_v55 }
 0x1bc   : > { %4323 = vmatmul.mubr.f32.gmra.mrb[2].mxu1 %v5864_v47  ;;  %4563 = vmatmul.mubr.f32.gmra.mrb[2].mxu0 %v5867_v63  ;;  %v6712_v47 = vand.u32 4294901760, %v5919_v4 }
 0x1bd   : > { %4325 = vmatprep.mubr.f32.mxu1 %v5896_v3  ;;  %4565 = vmatprep.mubr.f32.mxu0 %v5899_v53  ;;  %v1366_v3 = vand.u32 4294901760, %v512_v54  ;;  %v6110_v33 = vsub.f32 %v2993_v55, %v6087_v20 }
 0x1be   : > { %4782 = vmatpush3.bf16.msra.mxu1 %v5730_v32  ;;  %4878 = vmatpush3.bf16.msra.mxu0 %v5733_v23 }
 0x1bf   : > { %4784 = vmatprep.subr.bf16.mxu1 %v5757_v1  ;;  %4880 = vmatprep.subr.bf16.mxu0 %v5759_v45 }
 0x1c0   : > { %4326 = vmatmul.mubr.f32.gmra.mrb[4].mxu1 %v5916_v7  ;;  %4566 = vmatmul.mubr.f32.gmra.mrb[4].mxu0 %v5919_v4  ;;  %v504_v7 = vmul.f32 %v5773_v44, %v5522_v35 }
 0x1c1   : > { %4328 = vmatprep.mubr.f32.mxu1 %v5957_v61  ;;  %4568 = vmatprep.mubr.f32.mxu0 %v5963_v38  ;;  %v6093_v61 = vsub.f32 %v512_v54, %v1366_v3 }
 0x1c4   : > { %4329 = vmatmul.mubr.f32.gmra.mrb[6].mxu1 %v5954_v43  ;;  %4569 = vmatmul.mubr.f32.gmra.mrb[6].mxu0 %v5960_v21  ;;  %v1342_v43 = vsel %vm262_vm0, %v504_v7, 0 }
 0x1c5   : > { %4339 = vmatprep.mubr.f32.mxu1 %v6701_v22  ;;  %4579 = vmatprep.mubr.f32.mxu0 %v6702_v13  ;;  %v6119_v28 = vand.u32 4294901760, %v1342_v43  ;;  %v6714_v13 = vld [vmem:[#allocation5_spill] sm:$0xff] }
 0x1c8   : > { %4340 = vmatmul.mubr.f32.vlgmr.msra.gmra.mrb[0].mxu1 %v6703_v11  ;;  %4580 = vmatmul.mubr.f32.vlgmr.msra.gmra.mrb[0].mxu0 %v6704_v18  ;;  %v505_v11 = vmul.f32 %v5817_v39, %v6714_v13 }
 0x1c9   : > { %4786 = vmatpush3.bf16.msra.mxu1 %v5757_v1  ;;  %4882 = vmatpush3.bf16.msra.mxu0 %v5759_v45  ;;  %v503_v1 = vmul.f32 %v5765_v29, %v5505_v14  ;;  %v6708_v45 = vand.u32 4294901760, %v5867_v63  ;;  %v511_v14 = vld [vmem:[%s6629_s1] sm:$0xff] }
 0x1ca   : > { %4342 = vmatprep.mubr.f32.mxu1 %v6705_v36  ;;  %4582 = vmatprep.mubr.f32.mxu0 %v6706_v10  ;;  %v3971_v29 = vld [vmem:[%s6629_s1 + $0x60] sm:$0xff]  ;;  %v1363_v63 = vand.u32 4294901760, %v511_v14  ;;  %v513_v36 = vld [vmem:[%s6629_s1 + $0x10] sm:$0xff] }
 0x1cb   : > { %4788 = vmatprep.subr.bf16.mxu1 %v5761_v6  ;;  %4884 = vmatprep.subr.bf16.mxu0 %v5763_v8  ;;  %v3017_v53 = vand.u32 4294901760, %v3971_v29 }
 0x1cc   : > { %4343 = vmatmul.mubr.f32.gmra.mrb[2].mxu1 %v6707_v48  ;;  %4583 = vmatmul.mubr.f32.gmra.mrb[2].mxu0 %v6708_v45  ;;  %v6091_v4 = vsub.f32 %v511_v14, %v1363_v63  ;;  %v6663_v48 = vand.u32 4294901760, %v6110_v33 }
 0x1cd   : > { %4345 = vmatprep.mubr.f32.mxu1 %v6709_v26  ;;  %4585 = vmatprep.mubr.f32.mxu0 %v6710_v46  ;;  %v6095_v38 = vsub.f32 %v3971_v29, %v3017_v53  ;;  %v6165_v29 = vsub.f32 %v1342_v43, %v6119_v28  ;;  %v6715_v43 = vld [vmem:[#allocation10_spill] sm:$0xff] }
 0x1ce   : > { %4790 = vmatpush3.bf16.msra.mxu1 %v5761_v6  ;;  %4886 = vmatpush3.bf16.msra.mxu0 %v5763_v8  ;;  %v3972_v6 = vld [vmem:[%s6629_s1 + $0x68] sm:$0xff]  ;;  %v1339_v8 = vsel %vm262_vm0, %v503_v1, 0  ;;  %v6669_v21 = vand.u32 4294901760, %v6091_v4  ;;  %v3973_v1 = vld [vmem:[%s6629_s1 + $0x70] sm:$0xff]  ;;  %v2981_v13 = vmul.f32 %v5817_v39, %v6715_v43  ;;  %v6730_v39 = vld [vmem:[#allocation16_spill] sm:$0xff] }
 0x1cf   : > { %4792 = vmatprep.subr.bf16.mxu1 %v5709_v16  ;;  %4888 = vmatprep.subr.bf16.mxu0 %v5712_v34  ;;  %v3020_v25 = vand.u32 4294901760, %v3972_v6  ;;  %v6085_v31 = vand.u32 4294901760, %v1339_v8  ;;  %v6666_v62 = vand.u32 4294901760, %v6095_v38  ;;  %v3023_v55 = vand.u32 4294901760, %v3973_v1 }
 0x1d0   : > { %4346 = vmatmul.mubr.f32.gmra.mrb[4].mxu1 %v6711_v30  ;;  %4586 = vmatmul.mubr.f32.gmra.mrb[4].mxu0 %v6712_v47  ;;  %v1515_v45 = vsub.f32 %v6091_v4, %v6669_v21  ;;  %v1369_v30 = vand.u32 4294901760, %v513_v36  ;;  %v3026_v47 = vand.u32 4294901760, %v3974_v59  ;;  %v6723_v21 = vld [vmem:[#allocation18_spill] sm:$0xff] }
 0x1d1   : > { %4348 = vmatprep.mubr.f32.mxu1 %v683_v42  ;;  %4588 = vmatprep.mubr.f32.mxu0 %v2316_v0  ;;  %v6100_v35 = vsub.f32 %v3972_v6, %v3020_v25  ;;  %v6713_v42 = vld [vmem:[#allocation7_spill] sm:$0xff]  ;;  %v6130_v18 = vpack.c.bf16 %v3020_v25, %v3017_v53  ;;  %v3169_v46 = vsub.f32 %v6095_v38, %v6666_v62 }
 0x1d2   : > { %v2980_v0 = vmul.f32 %v5773_v44, %v6713_v42  ;;  %v6668_v42 = vand.u32 4294901760, %v6165_v29 }
 0x1d3   : > { %v6665_v44 = vand.u32 4294901760, %v6100_v35  ;;  %v3170_v53 = vand.u32 4294901760, %v3169_v46  ;;  %v6718_v46 = vld [vmem:[#allocation8_spill] sm:$0xff] }
 0x1d4   : > { %4349 = vmatmul.mubr.f32.gmra.mrb[6].mxu1 %v693_v17  ;;  %4589 = vmatmul.mubr.f32.gmra.mrb[6].mxu0 %v2326_v60  ;;  %v6107_v17 = vsub.f32 %v1339_v8, %v6085_v31  ;;  %v6667_v60 = vand.u32 4294901760, %v6093_v61  ;;  %v2996_v22 = vsel %vm262_vm0, %v2980_v0, 0  ;;  %v1345_v8 = vsel %vm262_vm0, %v505_v11, 0  ;;  %v6716_v11 = vld [vmem:[#allocation6_spill] sm:$0xff] }
 0x1d5   : > { %4359 = vmatprep.mubr.f32.mxu1 %v5775_v58  ;;  %4599 = vmatprep.mubr.f32.mxu0 %v5777_v56  ;;  %v6157_v14 = vand.u32 4294901760, %v2996_v22  ;;  %v3176_v54 = vsub.f32 %v6100_v35, %v6665_v44  ;;  %v6190_v0 = vand.u32 4294901760, %v1345_v8  ;;  %v6721_v44 = vld [vmem:[#allocation14_spill] sm:$0xff] }
 0x1d6   : > { %v6664_v10 = vand.u32 4294901760, %v6107_v17  ;;  %v1522_v26 = vsub.f32 %v6093_v61, %v6667_v60  ;;  %v2983_v62 = vmul.f32 %v5877_v15, %v6721_v44 }
 0x1d7   : > { %v6185_v7 = vsub.f32 %v2996_v22, %v6157_v14  ;;  %v3177_v25 = vand.u32 4294901760, %v3176_v54  ;;  %v6203_v54 = vpack.c.bf16 %v3026_v47, %v3023_v55  ;;  %v6223_v44 = vsub.f32 %v1345_v8, %v6190_v0  ;;  %v6722_v8 = vld [vmem:[#allocation9_spill] sm:$0xff] }
 0x1d8   : > { %4360 = vmatmul.mubr.f32.vlgmr.msra.gmra.mrb[0].mxu1 %v5793_v37  ;;  %4600 = vmatmul.mubr.f32.vlgmr.msra.gmra.mrb[0].mxu0 %v5795_v19  ;;  %v508_v43 = vmul.f32 %v6723_v21, %v6722_v8 }
 0x1d9   : > { %4794 = vmatpush3.bf16.msra.mxu1 %v5709_v16  ;;  %4890 = vmatpush3.bf16.msra.mxu0 %v5712_v34  ;;  %v6128_v16 = vpack.c.bf16 %v1366_v3, %v1363_v63  ;;  %v514_v34 = vld [vmem:[%s6629_s1 + $0x18] sm:$0xff]  ;;  %v6175_v63 = vsub.f32 %v6107_v17, %v6664_v10  ;;  %v6180_v3 = vsub.f32 %v6110_v33, %v6663_v48 }
 0x1da   : > { %4362 = vmatprep.mubr.f32.mxu1 %v5827_v9  ;;  %4602 = vmatprep.mubr.f32.mxu0 %v5831_v2  ;;  %v1372_v6 = vand.u32 4294901760, %v514_v34  ;;  %v507_v48 = vmul.f32 %v5877_v15, %v6718_v46  ;;  %6720 = vst [vmem:[#allocation5_spill] sm:$0xff] %v6203_v54  ;;  %v6220_v15 = vsub.f32 %v6165_v29, %v6668_v42  ;;  %v2999_v46 = vsel %vm262_vm0, %v2981_v13, 0 }
 0x1db   : > { %4796 = vmatprep.subr.bf16.mxu1 %v5730_v32  ;;  %4892 = vmatprep.subr.bf16.mxu0 %v5733_v23  ;;  %v6235_v42 = vsub.f32 %v3973_v1, %v3023_v55  ;;  %v6245_v13 = vsub.f32 %v3974_v59, %v3026_v47  ;;  %v6253_v1 = vand.u32 4294901760, %v2999_v46  ;;  %v6727_v55 = vld [vmem:[#allocation17_spill] sm:$0xff] }
 0x1dc   : > { %4363 = vmatmul.mubr.f32.gmra.mrb[2].mxu1 %v5851_v52  ;;  %4603 = vmatmul.mubr.f32.gmra.mrb[2].mxu0 %v5853_v27  ;;  %v6201_v10 = vpack.c.bf16 %v1372_v6, %v1369_v30  ;;  %v6233_v60 = vsub.f32 %v514_v34, %v1372_v6  ;;  %v6726_v34 = vld [vmem:[#allocation20_spill] sm:$0xff] }
 0x1dd   : > { %4365 = vmatprep.mubr.f32.mxu1 %v5887_v5  ;;  %4605 = vmatprep.mubr.f32.mxu0 %v5889_v12  ;;  %v2985_v59 = vmul.f32 %v6726_v34, %v6727_v55  ;;  %v6672_v8 = vand.u32 4294901760, %v6235_v42  ;;  %v6674_v55 = vand.u32 4294901760, %v6245_v13 }
 0x1de   : > { %4798 = vmatpush3.bf16.msra.mxu1 %v5730_v32  ;;  %4894 = vmatpush3.bf16.msra.mxu0 %v5733_v23  ;;  %v1516_v32 = vand.u32 4294901760, %v1515_v45  ;;  %v1523_v23 = vand.u32 4294901760, %v1522_v26  ;;  %v506_v45 = vmul.f32 %v5825_v41, %v6716_v11  ;;  %v6717_v26 = vld [vmem:[#allocation11_spill] sm:$0xff]  ;;  %6719 = vst [vmem:[#allocation7_spill] sm:$0xff] %v6201_v10 }
 0x1df   : > { %4800 = vmatprep.subr.bf16.mxu1 %v6128_v16  ;;  %4896 = vmatprep.subr.bf16.mxu0 %v6130_v18  ;;  %v2982_v22 = vmul.f32 %v5825_v41, %v6717_v26  ;;  %v6670_v41 = vand.u32 4294901760, %v6185_v7  ;;  %v6215_v26 = vpack.c.bf16 %v3177_v25, %v3170_v53  ;;  %v6230_v53 = vsub.f32 %v513_v36, %v1369_v30  ;;  %v6724_v36 = vld [vmem:[#allocation15_spill] sm:$0xff] }
 0x1e0   : > { %4366 = vmatmul.mubr.f32.gmra.mrb[4].mxu1 %v5905_v51  ;;  %4606 = vmatmul.mubr.f32.gmra.mrb[4].mxu0 %v5907_v49  ;;  %v6210_v11 = vpack.c.bf16 %v1523_v23, %v1516_v32  ;;  %v1348_v32 = vsel %vm262_vm0, %v506_v45, 0  ;;  %v3005_v25 = vsel %vm262_vm0, %v2983_v62, 0  ;;  %v6725_v62 = vld [vmem:[#allocation12_spill] sm:$0xff] }
 0x1e1   : > { %4368 = vmatprep.mubr.f32.mxu1 %v5946_v24  ;;  %4608 = vmatprep.mubr.f32.mxu0 %v5951_v57  ;;  %v3002_v23 = vsel %vm262_vm0, %v2982_v22, 0  ;;  %v509_v30 = vmul.f32 %v6726_v34, %v6725_v62  ;;  %v6266_v45 = vand.u32 4294901760, %v3005_v25  ;;  %v6671_v22 = vand.u32 4294901760, %v6233_v60  ;;  %v6728_v62 = vld [vmem:[#allocation13_spill] sm:$0xff] }
 0x1e2   : > { %v6257_v6 = vand.u32 4294901760, %v3002_v23 }
 0x1e4   : > { %4369 = vmatmul.mubr.f32.gmra.mrb[6].mxu1 %v5944_v50  ;;  %4609 = vmatmul.mubr.f32.gmra.mrb[6].mxu0 %v5949_v40 }
 0x1e5   : > { %4379 = vmatprep.mubr.f32.mxu1 %v5775_v58  ;;  %4619 = vmatprep.mubr.f32.mxu0 %v5777_v56  ;;  %v1351_v58 = vsel %vm262_vm0, %v507_v48, 0  ;;  %v6243_v56 = vsub.f32 %v6185_v7, %v6670_v41  ;;  %v2984_v48 = vmul.f32 %v6723_v21, %v6724_v36  ;;  %v1354_v36 = vsel %vm262_vm0, %v508_v43, 0 }
 0x1e6   : > { %v6264_v47 = vand.u32 4294901760, %v1351_v58  ;;  %v6286_v43 = vsub.f32 %v2999_v46, %v6253_v1  ;;  %v6306_v46 = vand.u32 4294901760, %v1354_v36 }
 0x1e7   : > { %v3008_v41 = vsel %vm262_vm0, %v2984_v48, 0  ;;  %v3011_v48 = vsel %vm262_vm0, %v2985_v59, 0 }
 0x1e8   : > { %4380 = vmatmul.mubr.f32.vlgmr.msra.gmra.mrb[0].mxu1 %v5793_v37  ;;  %4620 = vmatmul.mubr.f32.vlgmr.msra.gmra.mrb[0].mxu0 %v5795_v19  ;;  %v6255_v37 = vand.u32 4294901760, %v1348_v32  ;;  %v6673_v19 = vand.u32 4294901760, %v6230_v53  ;;  %v6326_v59 = vand.u32 4294901760, %v3011_v48 }
 0x1e9   : > { %4802 = vmatpush3.bf16.msra.mxu1 %v6128_v16  ;;  %4898 = vmatpush3.bf16.msra.mxu0 %v6130_v18 }
 0x1ea   : > { %4382 = vmatprep.mubr.f32.mxu1 %v5827_v9  ;;  %4622 = vmatprep.mubr.f32.mxu0 %v5831_v2  ;;  %v6729_v9 = vld [vmem:[#allocation19_spill] sm:$0xff]  ;;  %v1357_v2 = vsel %vm262_vm0, %v509_v30, 0  ;;  %v3190_v30 = vsub.f32 %v6245_v13, %v6674_v55 }
 0x1eb   : > { %4804 = vmatprep.subr.bf16.mxu1 %v6201_v10  ;;  %v510_v34 = vmul.f32 %v6729_v9, %v6728_v62  ;;  %4900 = vmatprep.subr.bf16.mxu0 %v6203_v54  ;;  %v2986_v21 = vmul.f32 %v6729_v9, %v6730_v39  ;;  %v6292_v62 = vsub.f32 %v3002_v23, %v6257_v6  ;;  %v6315_v23 = vand.u32 4294901760, %v1357_v2 }
 0x1ec   : > { %4383 = vmatmul.mubr.f32.gmra.mrb[2].mxu1 %v5851_v52  ;;  %4623 = vmatmul.mubr.f32.gmra.mrb[2].mxu0 %v5853_v27  ;;  %v6289_v52 = vsub.f32 %v1348_v32, %v6255_v37  ;;  %v6298_v39 = vsub.f32 %v1351_v58, %v6264_v47  ;;  %v6301_v27 = vsub.f32 %v3005_v25, %v6266_v45  ;;  %v6313_v32 = vand.u32 4294901760, %v3008_v41 }
 0x1ed   : > { %4385 = vmatprep.mubr.f32.mxu1 %v5887_v5  ;;  %6731 = vst [vmem:[#allocation10_spill] sm:$0xff] %v6292_v62  ;;  %4625 = vmatprep.mubr.f32.mxu0 %v5889_v12  ;;  %v1529_v5 = vsub.f32 %v6230_v53, %v6673_v19  ;;  %v1536_v12 = vsub.f32 %v6233_v60, %v6671_v22  ;;  %v1360_v58 = vsel %vm262_vm0, %v510_v34, 0  ;;  %v3014_v9 = vsel %vm262_vm0, %v2986_v21, 0 }
 0x1ee   : > { %4806 = vmatpush3.bf16.msra.mxu1 %v6201_v10  ;;  %4902 = vmatpush3.bf16.msra.mxu0 %v6203_v54  ;;  %v3183_v25 = vsub.f32 %v6235_v42, %v6672_v8  ;;  %v6679_v22 = vand.u32 4294901760, %v6286_v43  ;;  %v6680_v19 = vand.u32 4294901760, %v6292_v62  ;;  %v6340_v21 = vsub.f32 %v1354_v36, %v6306_v46 }
 0x1ef   : > { %4808 = vmatprep.subr.bf16.mxu1 %v6210_v11  ;;  %4904 = vmatprep.subr.bf16.mxu0 %v6215_v26  ;;  %v1530_v54 = vand.u32 4294901760, %v1529_v5  ;;  %v6345_v10 = vsub.f32 %v3008_v41, %v6313_v32  ;;  %v6350_v8 = vand.u32 4294901760, %v3014_v9  ;;  %v3191_v5 = vand.u32 4294901760, %v3190_v30 }
 0x1f0   : > { %4386 = vmatmul.mubr.f32.gmra.mrb[4].mxu1 %v5905_v51  ;;  %4626 = vmatmul.mubr.f32.gmra.mrb[4].mxu0 %v5907_v49  ;;  %v6732_v51 = vand.u32 4294901760, %v6223_v44  ;;  %v6342_v49 = vand.u32 4294901760, %v1360_v58  ;;  %v3184_v55 = vand.u32 4294901760, %v3183_v25  ;;  %v6355_v36 = vsub.f32 %v3011_v48, %v6326_v59 }
 0x1f1   : > { %4388 = vmatprep.mubr.f32.mxu1 %v5946_v24  ;;  %4628 = vmatprep.mubr.f32.mxu0 %v5951_v57  ;;  %v1537_v24 = vand.u32 4294901760, %v1536_v12  ;;  %v6733_v12 = vand.u32 4294901760, %v6175_v63  ;;  %v1445_v41 = vand.u32 4294901760, %v6220_v15  ;;  %v6734_v57 = vand.u32 4294901760, %v6289_v52 }
 0x1f2   : > { %v1454_v34 = vsub.f32 %v6223_v44, %v6732_v51  ;;  %v6348_v51 = vsub.f32 %v1357_v2, %v6315_v23  ;;  %v3099_v2 = vand.u32 4294901760, %v6243_v56  ;;  %v6735_v48 = vand.u32 4294901760, %v6180_v3 }
 0x1f3   : > { %v1464_v25 = vsub.f32 %v6289_v52, %v6734_v57  ;;  %v6736_v63 = vand.u32 4294901760, %v6298_v39  ;;  %v6378_v30 = vsub.f32 %v1360_v58, %v6342_v49  ;;  %v6383_v3 = vsub.f32 %v3014_v9, %v6350_v8 }
 0x1f4   : > { %4389 = vmatmul.mubr.f32.gmra.mrb[6].mxu1 %v5944_v50  ;;  %4629 = vmatmul.mubr.f32.gmra.mrb[6].mxu0 %v5949_v40  ;;  %v3108_v50 = vsub.f32 %v6286_v43, %v6679_v22  ;;  %v3118_v40 = vsub.f32 %v6292_v62, %v6680_v19  ;;  %v3137_v22 = vand.u32 4294901760, %v6345_v10  ;;  %v6737_v19 = vand.u32 4294901760, %v6301_v27 }
 0x1f5   : > { %4399 = vmatprep.mubr.f32.mxu1 %v6733_v12  ;;  %4639 = vmatprep.mubr.f32.mxu0 %v6735_v48  ;;  %v1474_v15 = vsub.f32 %v6298_v39, %v6736_v63  ;;  %v4811_v12 = vpack.c.bf16 %v1537_v24, %v1530_v54  ;;  %v1455_v48 = vand.u32 4294901760, %v1454_v34  ;;  %v4907_v63 = vpack.c.bf16 %v3191_v5, %v3184_v55 }
 0x1f6   : > { %v3128_v62 = vsub.f32 %v6301_v27, %v6737_v19  ;;  %v3147_v56 = vand.u32 4294901760, %v6355_v36  ;;  %v3109_v54 = vand.u32 4294901760, %v3108_v50  ;;  %v1465_v58 = vand.u32 4294901760, %v1464_v25 }
 0x1f7   : > { %v3119_v24 = vand.u32 4294901760, %v3118_v40  ;;  %v1475_v9 = vand.u32 4294901760, %v1474_v15  ;;  %v1503_v57 = vand.u32 4294901760, %v6378_v30  ;;  %v6739_v19 = vand.u32 4294901760, %v6348_v51 }
 0x1f8   : > { %4400 = vmatmul.mubr.f32.vlgmr.msra.gmra.mrb[0].mxu1 %v1445_v41  ;;  %4640 = vmatmul.mubr.f32.vlgmr.msra.gmra.mrb[0].mxu0 %v3099_v2  ;;  %v6738_v41 = vand.u32 4294901760, %v6340_v21  ;;  %v4815_v5 = vpack.c.bf16 %v6093_v61, %v6091_v4  ;;  %v3129_v2 = vand.u32 4294901760, %v3128_v62  ;;  %v3148_v50 = vsub.f32 %v6355_v36, %v3147_v56 }
 0x1f9   : > { %4810 = vmatpush3.bf16.msra.mxu1 %v6210_v11  ;;  %4906 = vmatpush3.bf16.msra.mxu0 %v6215_v26  ;;  %v3138_v11 = vsub.f32 %v6345_v10, %v3137_v22  ;;  %v1494_v55 = vsub.f32 %v6348_v51, %v6739_v19  ;;  %v3157_v26 = vand.u32 4294901760, %v6383_v3  ;;  %v4911_v25 = vpack.c.bf16 %v6100_v35, %v6095_v38 }
 0x1fa   : > { %4402 = vmatprep.mubr.f32.mxu1 %v1455_v48  ;;  %v1484_v34 = vsub.f32 %v6340_v21, %v6738_v41  ;;  %4642 = vmatprep.mubr.f32.mxu0 %v3109_v54  ;;  %v1504_v15 = vsub.f32 %v6378_v30, %v1503_v57  ;;  %v6740_v41 = vld [vmem:[#allocation7_spill] sm:$0xff] }
 0x1fb   : > { %4812 = vmatprep.subr.bf16.mxu1 %v4811_v12  ;;  %4908 = vmatprep.subr.bf16.mxu0 %v4907_v63  ;;  %v3139_v48 = vand.u32 4294901760, %v3138_v11  ;;  %v1495_v62 = vand.u32 4294901760, %v1494_v55  ;;  %v3158_v54 = vsub.f32 %v6383_v3, %v3157_v26  ;;  %v6742_v11 = vand.u32 4294901760, %v6093_v61  ;;  %v6743_v55 = vld [vmem:[#allocation5_spill] sm:$0xff] }
 0x1fc   : > { %4403 = vmatmul.mubr.f32.gmra.mrb[2].mxu1 %v1465_v58  ;;  %4643 = vmatmul.mubr.f32.gmra.mrb[2].mxu0 %v3119_v24  ;;  %v1485_v40 = vand.u32 4294901760, %v1484_v34  ;;  %v3149_v58 = vand.u32 4294901760, %v3148_v50  ;;  %v1505_v24 = vand.u32 4294901760, %v1504_v15  ;;  %v6741_v34 = vand.u32 4294901760, %v6091_v4 }
 0x1fd   : > { %4405 = vmatprep.mubr.f32.mxu1 %v1475_v9  ;;  %4645 = vmatprep.mubr.f32.mxu0 %v3129_v2  ;;  %v4915_v9 = vpack.c.bf16 %v6245_v13, %v6235_v42  ;;  %v6745_v2 = vand.u32 4294901760, %v6100_v35  ;;  %v6747_v4 = vand.u32 4294901760, %v6107_v17  ;;  %v6748_v61 = vand.u32 4294901760, %v6110_v33 }
 0x1fe   : > { %4814 = vmatpush3.bf16.msra.mxu1 %v4811_v12  ;;  %4910 = vmatpush3.bf16.msra.mxu0 %v4907_v63  ;;  %v3159_v12 = vand.u32 4294901760, %v3158_v54  ;;  %v4819_v63 = vpack.c.bf16 %v6233_v60, %v6230_v53  ;;  %v4831_v19 = vpack.c.bf16 %v6742_v11, %v6741_v34  ;;  %v6750_v35 = vand.u32 4294901760, %v6233_v60 }
 0x1ff   : > { %4816 = vmatprep.subr.bf16.mxu1 %v4815_v5  ;;  %4912 = vmatprep.subr.bf16.mxu0 %v4911_v25  ;;  %v6751_v15 = vand.u32 4294901760, %v6165_v29  ;;  %v6757_v60 = vand.u32 4294901760, %v6289_v52 }
 0x200   : > { %4406 = vmatmul.mubr.f32.gmra.mrb[4].mxu1 %v1485_v40  ;;  %4646 = vmatmul.mubr.f32.gmra.mrb[4].mxu0 %v3139_v48  ;;  %v6752_v48 = vand.u32 4294901760, %v6235_v42  ;;  %v6759_v42 = vand.u32 4294901760, %v6298_v39 }
 0x201   : > { %4408 = vmatprep.mubr.f32.mxu1 %v1495_v62  ;;  %4648 = vmatprep.mubr.f32.mxu0 %v3149_v58  ;;  %v6753_v62 = vand.u32 4294901760, %v6245_v13  ;;  %v6762_v13 = vand.u32 4294901760, %v6348_v51 }
 0x203   : > { %v4931_v54 = vpack.c.bf16 %v6753_v62, %v6752_v48 }
 0x204   : > { %4409 = vmatmul.mubr.f32.gmra.mrb[6].mxu1 %v1505_v24  ;;  %4649 = vmatmul.mubr.f32.gmra.mrb[6].mxu0 %v3159_v12 }
 0x205   : > { %4419 = vmatprep.mubr.f32.mxu1 %v6085_v31  ;;  %4659 = vmatprep.mubr.f32.mxu0 %v6087_v20 }
 0x208   : > { %4420 = vmatmul.mubr.f32.vlgmr.msra.gmra.mrb[0].mxu1 %v6119_v28  ;;  %4660 = vmatmul.mubr.f32.vlgmr.msra.gmra.mrb[0].mxu0 %v6157_v14 }
 0x209   : > { %4818 = vmatpush3.bf16.msra.mxu1 %v4815_v5  ;;  %4914 = vmatpush3.bf16.msra.mxu0 %v4911_v25  ;;  %v6744_v5 = vand.u32 4294901760, %v6095_v38  ;;  %v6746_v25 = vld [vmem:[#allocation10_spill] sm:$0xff]  ;;  %v6749_v38 = vand.u32 4294901760, %v6230_v53  ;;  %v6756_v53 = vand.u32 4294901760, %v6286_v43 }
 0x20a   : > { %4422 = vmatprep.mubr.f32.mxu1 %v6190_v0  ;;  %4662 = vmatprep.mubr.f32.mxu0 %v6253_v1 }
 0x20b   : > { %4820 = vmatprep.subr.bf16.mxu1 %v4819_v63  ;;  %4916 = vmatprep.subr.bf16.mxu0 %v4915_v9  ;;  %v4927_v50 = vpack.c.bf16 %v6745_v2, %v6744_v5  ;;  %v4835_v40 = vpack.c.bf16 %v6750_v35, %v6749_v38 }
 0x20c   : > { %4423 = vmatmul.mubr.f32.gmra.mrb[2].mxu1 %v6255_v37  ;;  %4663 = vmatmul.mubr.f32.gmra.mrb[2].mxu0 %v6257_v6 }
 0x20d   : > { %4425 = vmatprep.mubr.f32.mxu1 %v6264_v47  ;;  %4665 = vmatprep.mubr.f32.mxu0 %v6266_v45 }
 0x20e   : > { %4822 = vmatpush3.bf16.msra.mxu1 %v4819_v63  ;;  %4918 = vmatpush3.bf16.msra.mxu0 %v4915_v9 }
 0x20f   : > { %4824 = vmatprep.subr.bf16.mxu1 %v6128_v16  ;;  %4920 = vmatprep.subr.bf16.mxu0 %v6130_v18 }
 0x210   : > { %4426 = vmatmul.mubr.f32.gmra.mrb[4].mxu1 %v6306_v46  ;;  %4666 = vmatmul.mubr.f32.gmra.mrb[4].mxu0 %v6313_v32 }
 0x211   : > { %4428 = vmatprep.mubr.f32.mxu1 %v6315_v23  ;;  %4668 = vmatprep.mubr.f32.mxu0 %v6326_v59 }
 0x214   : > { %4429 = vmatmul.mubr.f32.gmra.mrb[6].mxu1 %v6342_v49  ;;  %4669 = vmatmul.mubr.f32.gmra.mrb[6].mxu0 %v6350_v8 }
 0x215   : > { %4439 = vmatprep.mubr.f32.mxu1 %v6107_v17  ;;  %4679 = vmatprep.mubr.f32.mxu0 %v6110_v33  ;;  %v6754_v17 = vand.u32 4294901760, %v6185_v7  ;;  %v6755_v33 = vand.u32 4294901760, %v6223_v44 }
 0x218   : > { %4440 = vmatmul.mubr.f32.vlgmr.msra.gmra.mrb[0].mxu1 %v6165_v29  ;;  %4680 = vmatmul.mubr.f32.vlgmr.msra.gmra.mrb[0].mxu0 %v6185_v7  ;;  %v6758_v29 = vand.u32 4294901760, %v6746_v25  ;;  %v6760_v7 = vand.u32 4294901760, %v6301_v27 }
 0x219   : > { %4826 = vmatpush3.bf16.msra.mxu1 %v6128_v16  ;;  %4922 = vmatpush3.bf16.msra.mxu0 %v6130_v18 }
 0x21a   : > { %4442 = vmatprep.mubr.f32.mxu1 %v6223_v44  ;;  %4682 = vmatprep.mubr.f32.mxu0 %v6286_v43  ;;  %v6761_v44 = vand.u32 4294901760, %v6340_v21 }
 0x21b   : > { %4828 = vmatprep.subr.bf16.mxu1 %v6740_v41  ;;  %4924 = vmatprep.subr.bf16.mxu0 %v6743_v55 }
 0x21c   : > { %4443 = vmatmul.mubr.f32.gmra.mrb[2].mxu1 %v6289_v52  ;;  %4683 = vmatmul.mubr.f32.gmra.mrb[2].mxu0 %v6746_v25 }
 0x21d   : > { %4445 = vmatprep.mubr.f32.mxu1 %v6298_v39  ;;  %4685 = vmatprep.mubr.f32.mxu0 %v6301_v27 }
 0x21e   : > { %4830 = vmatpush3.bf16.msra.mxu1 %v6740_v41  ;;  %4926 = vmatpush3.bf16.msra.mxu0 %v6743_v55 }
 0x21f   : > { %4832 = vmatprep.subr.bf16.mxu1 %v4831_v19  ;;  %4928 = vmatprep.subr.bf16.mxu0 %v4927_v50 }
 0x220   : > { %4446 = vmatmul.mubr.f32.gmra.mrb[4].mxu1 %v6340_v21  ;;  %4686 = vmatmul.mubr.f32.gmra.mrb[4].mxu0 %v6345_v10 }
 0x221   : > { %4448 = vmatprep.mubr.f32.mxu1 %v6348_v51  ;;  %4688 = vmatprep.mubr.f32.mxu0 %v6355_v36 }
 0x224   : > { %4449 = vmatmul.mubr.f32.gmra.mrb[6].mxu1 %v6378_v30  ;;  %4689 = vmatmul.mubr.f32.gmra.mrb[6].mxu0 %v6383_v3 }
 0x225   : > { %4459 = vmatprep.mubr.f32.mxu1 %v6747_v4  ;;  %4699 = vmatprep.mubr.f32.mxu0 %v6748_v61 }
 0x228   : > { %4460 = vmatmul.mubr.f32.vlgmr.msra.gmra.mrb[0].mxu1 %v6751_v15  ;;  %4700 = vmatmul.mubr.f32.vlgmr.msra.gmra.mrb[0].mxu0 %v6754_v17 }
 0x229   : > { %4834 = vmatpush3.bf16.msra.mxu1 %v4831_v19  ;;  %4930 = vmatpush3.bf16.msra.mxu0 %v4927_v50 }
 0x22a   : > { %4462 = vmatprep.mubr.f32.mxu1 %v6755_v33  ;;  %4702 = vmatprep.mubr.f32.mxu0 %v6756_v53 }
 0x22b   : > { %4836 = vmatprep.subr.bf16.mxu1 %v4835_v40  ;;  %4932 = vmatprep.subr.bf16.mxu0 %v4931_v54 }
 0x22c   : > { %4463 = vmatmul.mubr.f32.gmra.mrb[2].mxu1 %v6757_v60  ;;  %4703 = vmatmul.mubr.f32.gmra.mrb[2].mxu0 %v6758_v29 }
 0x22d   : > { %4465 = vmatprep.mubr.f32.mxu1 %v6759_v42  ;;  %4705 = vmatprep.mubr.f32.mxu0 %v6760_v7 }
 0x22e   : > { %4838 = vmatpush3.bf16.msra.mxu1 %v4835_v40  ;;  %4934 = vmatpush3.bf16.msra.mxu0 %v4931_v54 }
 0x22f   : > { %4840 = vmatprep.subr.bf16.mxu1 %v6128_v16  ;;  %4936 = vmatprep.subr.bf16.mxu0 %v6130_v18 }
 0x230   : > { %4466 = vmatmul.mubr.f32.gmra.mrb[4].mxu1 %v6761_v44  ;;  %4706 = vmatmul.mubr.f32.gmra.mrb[4].mxu0 %v3137_v22 }
 0x231   : > { %4468 = vmatprep.mubr.f32.mxu1 %v6762_v13  ;;  %4708 = vmatprep.mubr.f32.mxu0 %v3147_v56 }
 0x234   : > { %4469 = vmatmul.mubr.f32.gmra.mrb[6].mxu1 %v1503_v57  ;;  %4709 = vmatmul.mubr.f32.gmra.mrb[6].mxu0 %v3157_v26 }
 0x235   : > { %4479 = vmatprep.mubr.f32.mxu1 %v6085_v31  ;;  %4719 = vmatprep.mubr.f32.mxu0 %v6087_v20 }
 0x238   : > { %4480 = vmatmul.mubr.f32.vlgmr.msra.gmra.mrb[0].mxu1 %v6119_v28  ;;  %4720 = vmatmul.mubr.f32.vlgmr.msra.gmra.mrb[0].mxu0 %v6157_v14 }
 0x239   : > { %4842 = vmatpush3.bf16.msra.mxu1 %v6128_v16  ;;  %4938 = vmatpush3.bf16.msra.mxu0 %v6130_v18 }
 0x23a   : > { %4482 = vmatprep.mubr.f32.mxu1 %v6190_v0  ;;  %4722 = vmatprep.mubr.f32.mxu0 %v6253_v1 }
 0x23b   : > { %4844 = vmatprep.subr.bf16.mxu1 %v6740_v41  ;;  %4940 = vmatprep.subr.bf16.mxu0 %v6743_v55 }
 0x23c   : > { %4483 = vmatmul.mubr.f32.gmra.mrb[2].mxu1 %v6255_v37  ;;  %4723 = vmatmul.mubr.f32.gmra.mrb[2].mxu0 %v6257_v6 }
 0x23d   : > { %4485 = vmatprep.mubr.f32.mxu1 %v6264_v47  ;;  %4725 = vmatprep.mubr.f32.mxu0 %v6266_v45 }
 0x23e   : > { %4846 = vmatpush3.bf16.msra.mxu1 %v6740_v41  ;;  %4942 = vmatpush3.bf16.msra.mxu0 %v6743_v55 }
 0x240   : > { %4486 = vmatmul.mubr.f32.gmra.mrb[4].mxu1 %v6306_v46  ;;  %4726 = vmatmul.mubr.f32.gmra.mrb[4].mxu0 %v6313_v32 }
 0x241   : > { %4488 = vmatprep.mubr.f32.mxu1 %v6315_v23  ;;  %4728 = vmatprep.mubr.f32.mxu0 %v6326_v59 }
 0x244   : > { %4489 = vmatmul.mubr.f32.gmra.mrb[6].mxu1 %v6342_v49  ;;  %4729 = vmatmul.mubr.f32.gmra.mrb[6].mxu0 %v6350_v8 }
 0x245   : > { %4499 = vmatprep.mubr.f32.mxu1 %v6085_v31  ;;  %4739 = vmatprep.mubr.f32.mxu0 %v6087_v20 }
 0x248   : > { %4500 = vmatmul.mubr.f32.vlgmr.msra.gmra.mrb[0].mxu1 %v6119_v28  ;;  %4740 = vmatmul.mubr.f32.vlgmr.msra.gmra.mrb[0].mxu0 %v6157_v14  ;;  %v3975_v28 = vld [vmem:[%s6630_s2] ss:$0 sm:$0xff] }
 0x249   : > { %4502 = vmatprep.mubr.f32.mxu1 %v6190_v0  ;;  %4742 = vmatprep.mubr.f32.mxu0 %v6253_v1 }
 0x24c   : > { %4503 = vmatmul.mubr.f32.gmra.mrb[2].mxu1 %v6255_v37  ;;  %4743 = vmatmul.mubr.f32.gmra.mrb[2].mxu0 %v6257_v6 }
 0x24d   : > { %4505 = vmatprep.mubr.f32.mxu1 %v6264_v47  ;;  %4745 = vmatprep.mubr.f32.mxu0 %v6266_v45 }
 0x250   : > { %4506 = vmatmul.mubr.f32.gmra.mrb[4].mxu1 %v6306_v46  ;;  %4746 = vmatmul.mubr.f32.gmra.mrb[4].mxu0 %v6313_v32 }
 0x251   : > { %4508 = vmatprep.mubr.f32.mxu1 %v6315_v23  ;;  %4748 = vmatprep.mubr.f32.mxu0 %v6326_v59 }
 0x254   : > { %4509 = vmatmul.mubr.f32.gmra.mrb[6].mxu1 %v6342_v49  ;;  %4749 = vmatmul.mubr.f32.gmra.mrb[6].mxu0 %v6350_v8 }
 0x31b   : > { %v4501_v31 = vpop.f32.mrb[0].mxu1  ;;  %v4741_v20 = vpop.f32.mrb[0].mxu0 }
 0x31c   : > { %v2102_v16 = vpop.f32.mrb[1].mxu1  ;;  %v4943_v18 = vadd.f32 %v4741_v20, %v4501_v31  ;;  %v3756_v10 = vpop.f32.mrb[1].mxu0 }
 0x31d   : > { %v4944_v14 = vadd.f32 %v3756_v10, %v2102_v16 }
 0x31e   : > { %v3818_v0 = vadd.f32 %v4943_v18, %v3975_v28 }
 0x31f   : > { %v4504_v1 = vpop.f32.mrb[2].mxu1  ;;  %v3817_v37 = vadd.f32 %v4944_v14, %v3975_v28  ;;  %v4744_v6 = vpop.f32.mrb[2].mxu0 }
 0x320   : > { %v2114_v47 = vpop.f32.mrb[3].mxu1  ;;  %3826 = vst.msk [vmem:[%s6553_s6 + $0x8] sm:$0xff] %vm262_vm0, %v3818_v0  ;;  %v4945_v45 = vadd.f32 %v4744_v6, %v4504_v1  ;;  %v3768_v22 = vpop.f32.mrb[3].mxu0 }
 0x321   : > { %3825 = vst.msk [vmem:[%s6553_s6] sm:$0xff] %vm262_vm0, %v3817_v37  ;;  %v4946_v8 = vadd.f32 %v3768_v22, %v2114_v47 }
 0x322   : > { %v3820_v43 = vadd.f32 %v4945_v45, %v3975_v28 }
 0x323   : > { %v4507_v52 = vpop.f32.mrb[4].mxu1  ;;  %v3819_v39 = vadd.f32 %v4946_v8, %v3975_v28  ;;  %v4747_v27 = vpop.f32.mrb[4].mxu0 }
 0x324   : > { %v2126_v46 = vpop.f32.mrb[5].mxu1  ;;  %3828 = vst.msk [vmem:[%s6553_s6 + $0x18] sm:$0xff] %vm262_vm0, %v3820_v43  ;;  %v4947_v32 = vadd.f32 %v4747_v27, %v4507_v52  ;;  %v3780_v23 = vpop.f32.mrb[5].mxu0 }
 0x325   : > { %3827 = vst.msk [vmem:[%s6553_s6 + $0x10] sm:$0xff] %vm262_vm0, %v3819_v39  ;;  %v4948_v59 = vadd.f32 %v3780_v23, %v2126_v46 }
 0x326   : > { %v3822_v21 = vadd.f32 %v4947_v32, %v3975_v28 }
 0x327   : > { %v4510_v49 = vpop.f32.mrb[6].mxu1  ;;  %v3821_v51 = vadd.f32 %v4948_v59, %v3975_v28  ;;  %v4750_v36 = vpop.f32.mrb[6].mxu0 }
 0x328   : > { %v2138_v56 = vpop.f32.mrb[7].mxu1  ;;  %3830 = vst.msk [vmem:[%s6553_s6 + $0x28] sm:$0xff] %vm262_vm0, %v3822_v21  ;;  %v4949_v30 = vadd.f32 %v4750_v36, %v4510_v49  ;;  %v3792_v57 = vpop.f32.mrb[7].mxu0 }
 0x329   : > { %3829 = vst.msk [vmem:[%s6553_s6 + $0x20] sm:$0xff] %vm262_vm0, %v3821_v51  ;;  %v4950_v3 = vadd.f32 %v3792_v57, %v2138_v56 }
 0x32a   : > { %v3824_v26 = vadd.f32 %v4949_v30, %v3975_v28 }
 0x32b   : > { %v3823_v58 = vadd.f32 %v4950_v3, %v3975_v28 }
 0x32c   : > { %3832 = vst.msk [vmem:[%s6553_s6 + $0x38] sm:$0xff] %vm262_vm0, %v3824_v26 }
 0x32d   : > { %3831 = vst.msk [vmem:[%s6553_s6 + $0x30] sm:$0xff] %vm262_vm0, %v3823_v58 }
 0x32e   : > { %5213 = shalt.err (!%p5210_p5)
}
 0x32f   : > { %s5214_s26 = scalar_lea.hbm %s6572_s11, 1024  ;;  %s5218_s29 = scalar_lea.hbm %s6631_s3, 8192 }
 0x330   : > { %p5215_p6 = scmp.ne.s32.totalorder %s6572_s11, %s5214_s26  ;;  %p5219_p10 = scmp.lt.u32.totalorder %s6572_s11, %s6631_s3 }
 0x331   : > { %p5220_p11 = scmp.lt.u32.totalorder %s5218_s29, %s5214_s26  ;;  %p5222_p13 = scmp.lt.u32.totalorder %s5214_s26, %s6572_s11 }
 0x332   : > { %p5216_p7 = pnand %p5215_p6, %p5343_p4 }
 0x333   : > { %p5221_p12 = por %p5220_p11, %p5219_p10 }
 0x334   : > { %p5217_p9 = pneg %p5216_p7 }
 0x335   : > { %p5223_p0 = por %p5222_p13, %p5221_p12 }
 0x337   : > { %p5224_p1 = pnand %p5223_p0, %p5217_p9 }
 0x339   : > { %5227 = shalt.err (!%p5224_p1)
}
 0x33a   : > { %s5281_s5 = smov 128   ;;  %s5282_s6 = smov 8  }
 0x33b   : > { %5127 = dma.vmem_to_hbm [thread:$0]  (%p5343_p4), %s6574_s8, 1024, %s6572_s11, %s6582_s15, %s5281_s5, %s5281_s5, %s5282_s6  }
 0x33c PF: > { %p5133_p2 = scmp.ge.s32.totalorder %s5278_s17, 2  ;;  %s3864_s7 = sand.u32 1, %s5258_s12  }
 0x33d   : > { %s3865_s9 = scalar_lea.sflag [#allocation3], %s3864_s7 }
 0x33e   : > { %p5130_p3 = pnand %p5133_p2, %p5350_p8 }
 0x340   : > { %5253 = dma.done.wait (!%p5130_p3), %s3865_s9, 1024  }
 0x341   : > { %5255 = vsyncadd (!%p5130_p3), %s3865_s9, 4294966272  ;;  %s16_s17 = sadd.s32 1, %s5278_s17   ;;  %s6763_s12 = smov %s5262_s13 }
 0x342   : > { %p13_p5 = scmp.ge.s32.totalorder %s16_s17, 10   ;;  %s6764_s13 = smov %s5266_s14 }
 0x343   : > { %s6765_s14 = smov %s5356_s25  ;;  %s6766_s15 = smov %s5274_s16 }
 0x344   : > { %s6767_s16 = smov %s6769_s20  ;;  %15 = sbr.rel (!%p13_p5) target bundleno = 4 (0x4), region = 73 }
 0x34b   :  { %3870 = vsyncpa [#allocation3], 1 }
 0x34c   :  { %3872 = vsyncpa [#allocation3 + $0x1], 1 }

</bundles_post_ra>
